<compile_context>
chip_gen: v5e
topology: v5e:2x2
jax: 0.10.0
libtpu: 0.0.40
codegen_flags: <defaults>
</compile_context>

<pallas_src>
import jax
import jax.numpy as jnp
from jax.experimental import pallas as pl
from jax.experimental.pallas import tpu as pltpu


def _lstm_dqn_kernel(x_ref, wih_ref, whh_ref, b_ref, wfc_ref, bfc_ref, out_ref):
    B, T, In = x_ref.shape
    H = whh_ref.shape[0]
    H4 = whh_ref.shape[1]          # 4*H, PyTorch gate order [i, f, g, o]

    # --- One fused MXU call for the input projection of every timestep. ---
    # (B, T, In) -> (B*T, In) is a layout-preserving leading-dim merge.
    x_flat = x_ref[...].reshape(B * T, In)
    xw = (jnp.dot(x_flat, wih_ref[...], preferred_element_type=jnp.float32)
          + b_ref[...]).reshape(B, T, H4)                      # (B, T, 4H)

    whh = whh_ref[...]                                         # (H, 4H)

    # Lane mask: tanh on the 'g' (cell-candidate) gate lanes, sigmoid on the
    # i/f/o lanes -> two full-vreg EUP ops + one select instead of four
    # sub-vreg transcendental calls.
    lane = jax.lax.broadcasted_iota(jnp.int32, (B, H4), 1)
    g_lane = jnp.logical_and(lane >= 2 * H, lane < 3 * H)

    h = jnp.zeros((B, H), jnp.float32)
    c = jnp.zeros((B, H), jnp.float32)

    # --- Recurrence: fully unrolled (T is a small static constant), so every
    #     index below is static and the LLO scheduler sees the whole chain.
    #     Only one (B,H)x(H,4H) matmul per step remains on the MXU. ---
    for t in range(T):
        gates = xw[:, t, :] + jnp.dot(h, whh,
                                      preferred_element_type=jnp.float32)
        act = jnp.where(g_lane, jnp.tanh(gates), jax.nn.sigmoid(gates))
        i_g = act[:, 0 * H:1 * H]
        f_g = act[:, 1 * H:2 * H]
        g_g = act[:, 2 * H:3 * H]
        o_g = act[:, 3 * H:4 * H]
        c = f_g * c + i_g * g_g
        h = o_g * jnp.tanh(c)

    # --- Final Linear on the last hidden state; output is lane-padded. ---
    q = (jnp.dot(h, wfc_ref[...], preferred_element_type=jnp.float32)
         + bfc_ref[...])
    out_ref[...] = q.astype(out_ref.dtype)


def lstm_dqn_forward(x, params):
    """x: (B, T, input_size) float32 (batch_first). Returns (B, output_size)."""
    B, T, In = x.shape
    w_ih, w_hh, b_ih, b_hh, w_fc, b_fc = (
        params["w_ih"], params["w_hh"], params["b_ih"], params["b_hh"],
        params["w_fc"], params["b_fc"])
    H = w_hh.shape[1]
    Out = w_fc.shape[0]

    LANE = 128
    out_pad = ((Out + LANE - 1) // LANE) * LANE   # lane-dense output width

    # Pre-transposed weights, fused LSTM biases, zero-padded FC head.
    wih_t = w_ih.T.astype(jnp.float32)                          # (In, 4H)
    whh_t = w_hh.T.astype(jnp.float32)                          # (H, 4H)
    bias = (b_ih + b_hh).reshape(1, 4 * H).astype(jnp.float32)  # (1, 4H)
    wfc_t = jnp.zeros((H, out_pad), jnp.float32).at[:, :Out].set(w_fc.T)
    bfc = jnp.zeros((1, out_pad), jnp.float32).at[:, :Out].set(b_fc)

    q_pad = pl.pallas_call(
        _lstm_dqn_kernel,
        out_shape=jax.ShapeDtypeStruct((B, out_pad), jnp.float32),
        in_specs=[pl.BlockSpec(memory_space=pltpu.MemorySpace.VMEM)] * 6,
        out_specs=pl.BlockSpec(memory_space=pltpu.MemorySpace.VMEM),
    )(x.astype(jnp.float32), wih_t, whh_t, bias, wfc_t, bfc)

    return q_pad[:, :Out]


def _reference_forward(x, params):
    """Pure-JAX reference matching PyTorch LSTM + Linear semantics."""
    w_ih, w_hh, b_ih, b_hh = (params["w_ih"], params["w_hh"],
                              params["b_ih"], params["b_hh"])
    w_fc, b_fc = params["w_fc"], params["b_fc"]
    B, T, _ = x.shape
    H = w_hh.shape[1]
    h = jnp.zeros((B, H), jnp.float32)
    c = jnp.zeros((B, H), jnp.float32)
    for t in range(T):
        g = x[:, t, :] @ w_ih.T + b_ih + h @ w_hh.T + b_hh
        i = jax.nn.sigmoid(g[:, 0 * H:1 * H])
        f = jax.nn.sigmoid(g[:, 1 * H:2 * H])
        gg = jnp.tanh(g[:, 2 * H:3 * H])
        o = jax.nn.sigmoid(g[:, 3 * H:4 * H])
        c = f * c + i * gg
        h = o * jnp.tanh(c)
    return h @ w_fc.T + b_fc


def init_params(key, input_size, hidden_size, output_size):
    """Deterministic synthetic init (PyTorch-style uniform(-1/sqrt(H), 1/sqrt(H)))."""
    ks = jax.random.split(key, 6)
    bound = 1.0 / (hidden_size ** 0.5)
    u = lambda k, shape: jax.random.uniform(
        k, shape, jnp.float32, minval=-bound, maxval=bound)
    return {
        "w_ih": u(ks[0], (4 * hidden_size, input_size)),
        "w_hh": u(ks[1], (4 * hidden_size, hidden_size)),
        "b_ih": u(ks[2], (4 * hidden_size,)),
        "b_hh": u(ks[3], (4 * hidden_size,)),
        "w_fc": u(ks[4], (output_size, hidden_size)),
        "b_fc": u(ks[5], (output_size,)),
    }


if __name__ == "__main__":
    # Module globals imply hidden_size=64; small batch/seq/input/output.
    B, T, INPUT, HIDDEN, OUTPUT = 2, 8, 16, 64, 4

    key = jax.random.PRNGKey(0)
    k_x, k_p = jax.random.split(key)
    x = jax.random.normal(k_x, (B, T, INPUT), jnp.float32)
    params = init_params(k_p, INPUT, HIDDEN, OUTPUT)

    q = jax.jit(lstm_dqn_forward)(x, params)
    q = jax.block_until_ready(q)

    q_ref = _reference_forward(x, params)
    assert q.shape == (B, OUTPUT)
    assert jnp.allclose(q, q_ref, atol=2e-5, rtol=2e-5), (q, q_ref)

    print("KERNEL_OK")
</pallas_src>

<mosaic_0001>
module attributes {stable_mosaic.version = 11 : i64} {
  func.func @_lstm_dqn_kernel(%arg0: memref<2x8x16xf32, #tpu.memory_space<vmem>>, %arg1: memref<16x256xf32, #tpu.memory_space<vmem>>, %arg2: memref<64x256xf32, #tpu.memory_space<vmem>>, %arg3: memref<1x256xf32, #tpu.memory_space<vmem>>, %arg4: memref<64x128xf32, #tpu.memory_space<vmem>>, %arg5: memref<1x128xf32, #tpu.memory_space<vmem>>, %arg6: memref<2x128xf32, #tpu.memory_space<vmem>>) attributes {dimension_semantics = [], scalar_prefetch = 0 : i64, scratch_operands = 0 : i64, tpu.core_type = #tpu.core_type<tc>} {
    %c0 = arith.constant 0 : index
    %c0_0 = arith.constant 0 : index
    %c0_1 = arith.constant 0 : index
    %0 = vector.load %arg0[%c0, %c0_0, %c0_1] : memref<2x8x16xf32, #tpu.memory_space<vmem>>, vector<2x8x16xf32>
    %1 = vector.shape_cast %0 : vector<2x8x16xf32> to vector<16x16xf32>
    %c0_2 = arith.constant 0 : index
    %c0_3 = arith.constant 0 : index
    %2 = vector.load %arg1[%c0_2, %c0_3] : memref<16x256xf32, #tpu.memory_space<vmem>>, vector<16x256xf32>
    %cst = arith.constant dense<0.000000e+00> : vector<16x256xf32>
    %3 = tpu.matmul %1, %2, %cst {dimension_numbers = #tpu.dot_dimension_numbers<[1], [0], [0], [1], [0, 0, 1, 1], [], []>} : vector<16x16xf32>, vector<16x256xf32>, vector<16x256xf32> -> vector<16x256xf32>
    %c0_4 = arith.constant 0 : index
    %c0_5 = arith.constant 0 : index
    %4 = vector.load %arg3[%c0_4, %c0_5] : memref<1x256xf32, #tpu.memory_space<vmem>>, vector<1x256xf32>
    %5 = vector.broadcast %4 : vector<1x256xf32> to vector<16x256xf32>
    %6 = arith.addf %3, %5 : vector<16x256xf32>
    %7 = vector.shape_cast %6 : vector<16x256xf32> to vector<2x8x256xf32>
    %c0_6 = arith.constant 0 : index
    %c0_7 = arith.constant 0 : index
    %8 = vector.load %arg2[%c0_6, %c0_7] : memref<64x256xf32, #tpu.memory_space<vmem>>, vector<64x256xf32>
    %9 = tpu.iota {dimensions = array<i32: 1>} : vector<2x256xi32>
    %c128_i32 = arith.constant 128 : i32
    %10 = vector.broadcast %c128_i32 : i32 to vector<2x256xi32>
    %11 = arith.cmpi sge, %9, %10 : vector<2x256xi32>
    %c192_i32 = arith.constant 192 : i32
    %12 = vector.broadcast %c192_i32 : i32 to vector<2x256xi32>
    %13 = arith.cmpi slt, %9, %12 : vector<2x256xi32>
    %14 = arith.andi %11, %13 : vector<2x256xi1>
    %cst_8 = arith.constant 0.000000e+00 : f32
    %15 = vector.broadcast %cst_8 : f32 to vector<2x64xf32>
    %cst_9 = arith.constant 0.000000e+00 : f32
    %16 = vector.broadcast %cst_9 : f32 to vector<2x64xf32>
    %17 = vector.extract_strided_slice %7 {offsets = [0, 0, 0], sizes = [2, 1, 256], strides = [1, 1, 1]} : vector<2x8x256xf32> to vector<2x1x256xf32>
    %18 = vector.shape_cast %17 : vector<2x1x256xf32> to vector<2x256xf32>
    %cst_10 = arith.constant dense<0.000000e+00> : vector<2x256xf32>
    %19 = tpu.matmul %15, %8, %cst_10 {dimension_numbers = #tpu.dot_dimension_numbers<[1], [0], [0], [1], [0, 0, 1, 1], [], []>} : vector<2x64xf32>, vector<64x256xf32>, vector<2x256xf32> -> vector<2x256xf32>
    %20 = arith.addf %18, %19 : vector<2x256xf32>
    %21 = math.tanh %20 : vector<2x256xf32>
    %22 = arith.negf %20 : vector<2x256xf32>
    %23 = math.exp %22 : vector<2x256xf32>
    %cst_11 = arith.constant 1.000000e+00 : f32
    %24 = vector.broadcast %cst_11 : f32 to vector<2x256xf32>
    %25 = arith.addf %24, %23 : vector<2x256xf32>
    %26 = arith.divf %24, %25 : vector<2x256xf32>
    %27 = arith.select %14, %21, %26 : vector<2x256xi1>, vector<2x256xf32>
    %28 = vector.extract_strided_slice %27 {offsets = [0, 0], sizes = [2, 64], strides = [1, 1]} : vector<2x256xf32> to vector<2x64xf32>
    %29 = vector.extract_strided_slice %27 {offsets = [0, 64], sizes = [2, 64], strides = [1, 1]} : vector<2x256xf32> to vector<2x64xf32>
    %30 = vector.extract_strided_slice %27 {offsets = [0, 128], sizes = [2, 64], strides = [1, 1]} : vector<2x256xf32> to vector<2x64xf32>
    %31 = vector.extract_strided_slice %27 {offsets = [0, 192], sizes = [2, 64], strides = [1, 1]} : vector<2x256xf32> to vector<2x64xf32>
    %32 = arith.mulf %29, %16 : vector<2x64xf32>
    %33 = arith.mulf %28, %30 : vector<2x64xf32>
    %34 = arith.addf %32, %33 : vector<2x64xf32>
    %35 = math.tanh %34 : vector<2x64xf32>
    %36 = arith.mulf %31, %35 : vector<2x64xf32>
    %37 = vector.extract_strided_slice %7 {offsets = [0, 1, 0], sizes = [2, 1, 256], strides = [1, 1, 1]} : vector<2x8x256xf32> to vector<2x1x256xf32>
    %38 = vector.shape_cast %37 : vector<2x1x256xf32> to vector<2x256xf32>
    %cst_12 = arith.constant dense<0.000000e+00> : vector<2x256xf32>
    %39 = tpu.matmul %36, %8, %cst_12 {dimension_numbers = #tpu.dot_dimension_numbers<[1], [0], [0], [1], [0, 0, 1, 1], [], []>} : vector<2x64xf32>, vector<64x256xf32>, vector<2x256xf32> -> vector<2x256xf32>
    %40 = arith.addf %38, %39 : vector<2x256xf32>
    %41 = math.tanh %40 : vector<2x256xf32>
    %42 = arith.negf %40 : vector<2x256xf32>
    %43 = math.exp %42 : vector<2x256xf32>
    %cst_13 = arith.constant 1.000000e+00 : f32
    %44 = vector.broadcast %cst_13 : f32 to vector<2x256xf32>
    %45 = arith.addf %44, %43 : vector<2x256xf32>
    %46 = arith.divf %44, %45 : vector<2x256xf32>
    %47 = arith.select %14, %41, %46 : vector<2x256xi1>, vector<2x256xf32>
    %48 = vector.extract_strided_slice %47 {offsets = [0, 0], sizes = [2, 64], strides = [1, 1]} : vector<2x256xf32> to vector<2x64xf32>
    %49 = vector.extract_strided_slice %47 {offsets = [0, 64], sizes = [2, 64], strides = [1, 1]} : vector<2x256xf32> to vector<2x64xf32>
    %50 = vector.extract_strided_slice %47 {offsets = [0, 128], sizes = [2, 64], strides = [1, 1]} : vector<2x256xf32> to vector<2x64xf32>
    %51 = vector.extract_strided_slice %47 {offsets = [0, 192], sizes = [2, 64], strides = [1, 1]} : vector<2x256xf32> to vector<2x64xf32>
    %52 = arith.mulf %49, %34 : vector<2x64xf32>
    %53 = arith.mulf %48, %50 : vector<2x64xf32>
    %54 = arith.addf %52, %53 : vector<2x64xf32>
    %55 = math.tanh %54 : vector<2x64xf32>
    %56 = arith.mulf %51, %55 : vector<2x64xf32>
    %57 = vector.extract_strided_slice %7 {offsets = [0, 2, 0], sizes = [2, 1, 256], strides = [1, 1, 1]} : vector<2x8x256xf32> to vector<2x1x256xf32>
    %58 = vector.shape_cast %57 : vector<2x1x256xf32> to vector<2x256xf32>
    %cst_14 = arith.constant dense<0.000000e+00> : vector<2x256xf32>
    %59 = tpu.matmul %56, %8, %cst_14 {dimension_numbers = #tpu.dot_dimension_numbers<[1], [0], [0], [1], [0, 0, 1, 1], [], []>} : vector<2x64xf32>, vector<64x256xf32>, vector<2x256xf32> -> vector<2x256xf32>
    %60 = arith.addf %58, %59 : vector<2x256xf32>
    %61 = math.tanh %60 : vector<2x256xf32>
    %62 = arith.negf %60 : vector<2x256xf32>
    %63 = math.exp %62 : vector<2x256xf32>
    %cst_15 = arith.constant 1.000000e+00 : f32
    %64 = vector.broadcast %cst_15 : f32 to vector<2x256xf32>
    %65 = arith.addf %64, %63 : vector<2x256xf32>
    %66 = arith.divf %64, %65 : vector<2x256xf32>
    %67 = arith.select %14, %61, %66 : vector<2x256xi1>, vector<2x256xf32>
    %68 = vector.extract_strided_slice %67 {offsets = [0, 0], sizes = [2, 64], strides = [1, 1]} : vector<2x256xf32> to vector<2x64xf32>
    %69 = vector.extract_strided_slice %67 {offsets = [0, 64], sizes = [2, 64], strides = [1, 1]} : vector<2x256xf32> to vector<2x64xf32>
    %70 = vector.extract_strided_slice %67 {offsets = [0, 128], sizes = [2, 64], strides = [1, 1]} : vector<2x256xf32> to vector<2x64xf32>
    %71 = vector.extract_strided_slice %67 {offsets = [0, 192], sizes = [2, 64], strides = [1, 1]} : vector<2x256xf32> to vector<2x64xf32>
    %72 = arith.mulf %69, %54 : vector<2x64xf32>
    %73 = arith.mulf %68, %70 : vector<2x64xf32>
    %74 = arith.addf %72, %73 : vector<2x64xf32>
    %75 = math.tanh %74 : vector<2x64xf32>
    %76 = arith.mulf %71, %75 : vector<2x64xf32>
    %77 = vector.extract_strided_slice %7 {offsets = [0, 3, 0], sizes = [2, 1, 256], strides = [1, 1, 1]} : vector<2x8x256xf32> to vector<2x1x256xf32>
    %78 = vector.shape_cast %77 : vector<2x1x256xf32> to vector<2x256xf32>
    %cst_16 = arith.constant dense<0.000000e+00> : vector<2x256xf32>
    %79 = tpu.matmul %76, %8, %cst_16 {dimension_numbers = #tpu.dot_dimension_numbers<[1], [0], [0], [1], [0, 0, 1, 1], [], []>} : vector<2x64xf32>, vector<64x256xf32>, vector<2x256xf32> -> vector<2x256xf32>
    %80 = arith.addf %78, %79 : vector<2x256xf32>
    %81 = math.tanh %80 : vector<2x256xf32>
    %82 = arith.negf %80 : vector<2x256xf32>
    %83 = math.exp %82 : vector<2x256xf32>
    %cst_17 = arith.constant 1.000000e+00 : f32
    %84 = vector.broadcast %cst_17 : f32 to vector<2x256xf32>
    %85 = arith.addf %84, %83 : vector<2x256xf32>
    %86 = arith.divf %84, %85 : vector<2x256xf32>
    %87 = arith.select %14, %81, %86 : vector<2x256xi1>, vector<2x256xf32>
    %88 = vector.extract_strided_slice %87 {offsets = [0, 0], sizes = [2, 64], strides = [1, 1]} : vector<2x256xf32> to vector<2x64xf32>
    %89 = vector.extract_strided_slice %87 {offsets = [0, 64], sizes = [2, 64], strides = [1, 1]} : vector<2x256xf32> to vector<2x64xf32>
    %90 = vector.extract_strided_slice %87 {offsets = [0, 128], sizes = [2, 64], strides = [1, 1]} : vector<2x256xf32> to vector<2x64xf32>
    %91 = vector.extract_strided_slice %87 {offsets = [0, 192], sizes = [2, 64], strides = [1, 1]} : vector<2x256xf32> to vector<2x64xf32>
    %92 = arith.mulf %89, %74 : vector<2x64xf32>
    %93 = arith.mulf %88, %90 : vector<2x64xf32>
    %94 = arith.addf %92, %93 : vector<2x64xf32>
    %95 = math.tanh %94 : vector<2x64xf32>
    %96 = arith.mulf %91, %95 : vector<2x64xf32>
    %97 = vector.extract_strided_slice %7 {offsets = [0, 4, 0], sizes = [2, 1, 256], strides = [1, 1, 1]} : vector<2x8x256xf32> to vector<2x1x256xf32>
    %98 = vector.shape_cast %97 : vector<2x1x256xf32> to vector<2x256xf32>
    %cst_18 = arith.constant dense<0.000000e+00> : vector<2x256xf32>
    %99 = tpu.matmul %96, %8, %cst_18 {dimension_numbers = #tpu.dot_dimension_numbers<[1], [0], [0], [1], [0, 0, 1, 1], [], []>} : vector<2x64xf32>, vector<64x256xf32>, vector<2x256xf32> -> vector<2x256xf32>
    %100 = arith.addf %98, %99 : vector<2x256xf32>
    %101 = math.tanh %100 : vector<2x256xf32>
    %102 = arith.negf %100 : vector<2x256xf32>
    %103 = math.exp %102 : vector<2x256xf32>
    %cst_19 = arith.constant 1.000000e+00 : f32
    %104 = vector.broadcast %cst_19 : f32 to vector<2x256xf32>
    %105 = arith.addf %104, %103 : vector<2x256xf32>
    %106 = arith.divf %104, %105 : vector<2x256xf32>
    %107 = arith.select %14, %101, %106 : vector<2x256xi1>, vector<2x256xf32>
    %108 = vector.extract_strided_slice %107 {offsets = [0, 0], sizes = [2, 64], strides = [1, 1]} : vector<2x256xf32> to vector<2x64xf32>
    %109 = vector.extract_strided_slice %107 {offsets = [0, 64], sizes = [2, 64], strides = [1, 1]} : vector<2x256xf32> to vector<2x64xf32>
    %110 = vector.extract_strided_slice %107 {offsets = [0, 128], sizes = [2, 64], strides = [1, 1]} : vector<2x256xf32> to vector<2x64xf32>
    %111 = vector.extract_strided_slice %107 {offsets = [0, 192], sizes = [2, 64], strides = [1, 1]} : vector<2x256xf32> to vector<2x64xf32>
    %112 = arith.mulf %109, %94 : vector<2x64xf32>
    %113 = arith.mulf %108, %110 : vector<2x64xf32>
    %114 = arith.addf %112, %113 : vector<2x64xf32>
    %115 = math.tanh %114 : vector<2x64xf32>
    %116 = arith.mulf %111, %115 : vector<2x64xf32>
    %117 = vector.extract_strided_slice %7 {offsets = [0, 5, 0], sizes = [2, 1, 256], strides = [1, 1, 1]} : vector<2x8x256xf32> to vector<2x1x256xf32>
    %118 = vector.shape_cast %117 : vector<2x1x256xf32> to vector<2x256xf32>
    %cst_20 = arith.constant dense<0.000000e+00> : vector<2x256xf32>
    %119 = tpu.matmul %116, %8, %cst_20 {dimension_numbers = #tpu.dot_dimension_numbers<[1], [0], [0], [1], [0, 0, 1, 1], [], []>} : vector<2x64xf32>, vector<64x256xf32>, vector<2x256xf32> -> vector<2x256xf32>
    %120 = arith.addf %118, %119 : vector<2x256xf32>
    %121 = math.tanh %120 : vector<2x256xf32>
    %122 = arith.negf %120 : vector<2x256xf32>
    %123 = math.exp %122 : vector<2x256xf32>
    %cst_21 = arith.constant 1.000000e+00 : f32
    %124 = vector.broadcast %cst_21 : f32 to vector<2x256xf32>
    %125 = arith.addf %124, %123 : vector<2x256xf32>
    %126 = arith.divf %124, %125 : vector<2x256xf32>
    %127 = arith.select %14, %121, %126 : vector<2x256xi1>, vector<2x256xf32>
    %128 = vector.extract_strided_slice %127 {offsets = [0, 0], sizes = [2, 64], strides = [1, 1]} : vector<2x256xf32> to vector<2x64xf32>
    %129 = vector.extract_strided_slice %127 {offsets = [0, 64], sizes = [2, 64], strides = [1, 1]} : vector<2x256xf32> to vector<2x64xf32>
    %130 = vector.extract_strided_slice %127 {offsets = [0, 128], sizes = [2, 64], strides = [1, 1]} : vector<2x256xf32> to vector<2x64xf32>
    %131 = vector.extract_strided_slice %127 {offsets = [0, 192], sizes = [2, 64], strides = [1, 1]} : vector<2x256xf32> to vector<2x64xf32>
    %132 = arith.mulf %129, %114 : vector<2x64xf32>
    %133 = arith.mulf %128, %130 : vector<2x64xf32>
    %134 = arith.addf %132, %133 : vector<2x64xf32>
    %135 = math.tanh %134 : vector<2x64xf32>
    %136 = arith.mulf %131, %135 : vector<2x64xf32>
    %137 = vector.extract_strided_slice %7 {offsets = [0, 6, 0], sizes = [2, 1, 256], strides = [1, 1, 1]} : vector<2x8x256xf32> to vector<2x1x256xf32>
    %138 = vector.shape_cast %137 : vector<2x1x256xf32> to vector<2x256xf32>
    %cst_22 = arith.constant dense<0.000000e+00> : vector<2x256xf32>
    %139 = tpu.matmul %136, %8, %cst_22 {dimension_numbers = #tpu.dot_dimension_numbers<[1], [0], [0], [1], [0, 0, 1, 1], [], []>} : vector<2x64xf32>, vector<64x256xf32>, vector<2x256xf32> -> vector<2x256xf32>
    %140 = arith.addf %138, %139 : vector<2x256xf32>
    %141 = math.tanh %140 : vector<2x256xf32>
    %142 = arith.negf %140 : vector<2x256xf32>
    %143 = math.exp %142 : vector<2x256xf32>
    %cst_23 = arith.constant 1.000000e+00 : f32
    %144 = vector.broadcast %cst_23 : f32 to vector<2x256xf32>
    %145 = arith.addf %144, %143 : vector<2x256xf32>
    %146 = arith.divf %144, %145 : vector<2x256xf32>
    %147 = arith.select %14, %141, %146 : vector<2x256xi1>, vector<2x256xf32>
    %148 = vector.extract_strided_slice %147 {offsets = [0, 0], sizes = [2, 64], strides = [1, 1]} : vector<2x256xf32> to vector<2x64xf32>
    %149 = vector.extract_strided_slice %147 {offsets = [0, 64], sizes = [2, 64], strides = [1, 1]} : vector<2x256xf32> to vector<2x64xf32>
    %150 = vector.extract_strided_slice %147 {offsets = [0, 128], sizes = [2, 64], strides = [1, 1]} : vector<2x256xf32> to vector<2x64xf32>
    %151 = vector.extract_strided_slice %147 {offsets = [0, 192], sizes = [2, 64], strides = [1, 1]} : vector<2x256xf32> to vector<2x64xf32>
    %152 = arith.mulf %149, %134 : vector<2x64xf32>
    %153 = arith.mulf %148, %150 : vector<2x64xf32>
    %154 = arith.addf %152, %153 : vector<2x64xf32>
    %155 = math.tanh %154 : vector<2x64xf32>
    %156 = arith.mulf %151, %155 : vector<2x64xf32>
    %157 = vector.extract_strided_slice %7 {offsets = [0, 7, 0], sizes = [2, 1, 256], strides = [1, 1, 1]} : vector<2x8x256xf32> to vector<2x1x256xf32>
    %158 = vector.shape_cast %157 : vector<2x1x256xf32> to vector<2x256xf32>
    %cst_24 = arith.constant dense<0.000000e+00> : vector<2x256xf32>
    %159 = tpu.matmul %156, %8, %cst_24 {dimension_numbers = #tpu.dot_dimension_numbers<[1], [0], [0], [1], [0, 0, 1, 1], [], []>} : vector<2x64xf32>, vector<64x256xf32>, vector<2x256xf32> -> vector<2x256xf32>
    %160 = arith.addf %158, %159 : vector<2x256xf32>
    %161 = math.tanh %160 : vector<2x256xf32>
    %162 = arith.negf %160 : vector<2x256xf32>
    %163 = math.exp %162 : vector<2x256xf32>
    %cst_25 = arith.constant 1.000000e+00 : f32
    %164 = vector.broadcast %cst_25 : f32 to vector<2x256xf32>
    %165 = arith.addf %164, %163 : vector<2x256xf32>
    %166 = arith.divf %164, %165 : vector<2x256xf32>
    %167 = arith.select %14, %161, %166 : vector<2x256xi1>, vector<2x256xf32>
    %168 = vector.extract_strided_slice %167 {offsets = [0, 0], sizes = [2, 64], strides = [1, 1]} : vector<2x256xf32> to vector<2x64xf32>
    %169 = vector.extract_strided_slice %167 {offsets = [0, 64], sizes = [2, 64], strides = [1, 1]} : vector<2x256xf32> to vector<2x64xf32>
    %170 = vector.extract_strided_slice %167 {offsets = [0, 128], sizes = [2, 64], strides = [1, 1]} : vector<2x256xf32> to vector<2x64xf32>
    %171 = vector.extract_strided_slice %167 {offsets = [0, 192], sizes = [2, 64], strides = [1, 1]} : vector<2x256xf32> to vector<2x64xf32>
    %172 = arith.mulf %169, %154 : vector<2x64xf32>
    %173 = arith.mulf %168, %170 : vector<2x64xf32>
    %174 = arith.addf %172, %173 : vector<2x64xf32>
    %175 = math.tanh %174 : vector<2x64xf32>
    %176 = arith.mulf %171, %175 : vector<2x64xf32>
    %c0_26 = arith.constant 0 : index
    %c0_27 = arith.constant 0 : index
    %177 = vector.load %arg4[%c0_26, %c0_27] : memref<64x128xf32, #tpu.memory_space<vmem>>, vector<64x128xf32>
    %cst_28 = arith.constant dense<0.000000e+00> : vector<2x128xf32>
    %178 = tpu.matmul %176, %177, %cst_28 {dimension_numbers = #tpu.dot_dimension_numbers<[1], [0], [0], [1], [0, 0, 1, 1], [], []>} : vector<2x64xf32>, vector<64x128xf32>, vector<2x128xf32> -> vector<2x128xf32>
    %c0_29 = arith.constant 0 : index
    %c0_30 = arith.constant 0 : index
    %179 = vector.load %arg5[%c0_29, %c0_30] : memref<1x128xf32, #tpu.memory_space<vmem>>, vector<1x128xf32>
    %180 = vector.broadcast %179 : vector<1x128xf32> to vector<2x128xf32>
    %181 = arith.addf %178, %180 : vector<2x128xf32>
    %c0_31 = arith.constant 0 : index
    %c0_32 = arith.constant 0 : index
    %182 = vector.load %arg6[%c0_31, %c0_32] : memref<2x128xf32, #tpu.memory_space<vmem>>, vector<2x128xf32>
    tpu.vector_store %arg6[%c0_31, %c0_32], %181 {strides = array<i32>} : memref<2x128xf32, #tpu.memory_space<vmem>>, vector<2x128xf32>,
    return
  }
}

</mosaic_0001>

<bundles_post_ra>
// kernel: lstm_dqn_forward.1
= control target key start
LH: loop header
LB: loop body
LE: loop exit
PB: predicated region body
PF: predicated region fallthrough
CT: control target
= control target key end

     0   :  { %vm36_vm0 = vcmask 130048   ;;  %s2505_s0 = inlined_call_operand.vmem [shape: f32[2,8,16], index: 0, kind: input, shape index: {}]   ;;  %s2506_s1 = inlined_call_operand.vmem [shape: f32[16,256], index: 1, kind: input, shape index: {}]   ;;  %s2507_s2 = inlined_call_operand.vmem [shape: f32[64,256], index: 2, kind: input, shape index: {}]   ;;  %s2508_s3 = inlined_call_operand.vmem [shape: f32[1,256], index: 3, kind: input, shape index: {}]   ;;  %s2509_s4 = inlined_call_operand.vmem [shape: f32[64,128], index: 4, kind: input, shape index: {}]   ;;  %s2510_s5 = inlined_call_operand.vmem [shape: f32[1,128], index: 5, kind: input, shape index: {}]   ;;  %s2511_s6 = inlined_call_operand.hbm [shape: f32[2,128], index: 6, kind: output, shape index: {}]  }
   0x1   :  { %v1846_v0 = vld [vmem:[%s2507_s2 + $0x70] sm:$0xff]  ;;  %v1851_v1 = vld [vmem:[%s2507_s2 + $0x78] sm:$0xff]  ;;  %v1856_v2 = vld [vmem:[%s2507_s2 + $0x60] sm:$0xff] }
   0x2   :  { %126 = vmatpush.msra.mxu2 %v1846_v0  ;;  %146 = vmatpush.msra.mxu3 %v1851_v1  ;;  %v1863_v3 = vld [vmem:[%s2507_s2 + $0x68] sm:$0xff]  ;;  %v1868_v4 = vld [vmem:[%s2507_s2 + $0x50] sm:$0xff]  ;;  %v1873_v5 = vld [vmem:[%s2507_s2 + $0x58] sm:$0xff] }
   0x3   :  { %v28_v6 = vld [vmem:[%s2506_s1 + $0x10] sm:$0xff]  ;;  %v29_v7 = vld [vmem:[%s2506_s1 + $0x18] sm:$0xff]  ;;  %v1886_v8 = vld [vmem:[%s2507_s2 + $0x40] sm:$0xff] }
   0x4   :  { %127 = vmatpush.msra.mxu2 %v1856_v2  ;;  %147 = vmatpush.msra.mxu3 %v1863_v3  ;;  %v1891_v9 = vld [vmem:[%s2507_s2 + $0x48] sm:$0xff]  ;;  %v26_v10 = vld [vmem:[%s2506_s1] sm:$0xff]  ;;  %v1904_v12 = vld [vmem:[%s2507_s2 + $0x30] sm:$0xff] }
   0x5   :  { %57 = vmatpush.msra.mxu0 %v28_v6  ;;  %80 = vmatpush.msra.mxu1 %v29_v7  ;;  %v27_v11 = vld [vmem:[%s2506_s1 + $0x8] sm:$0xff]  ;;  %v1909_v13 = vld [vmem:[%s2507_s2 + $0x38] sm:$0xff]  ;;  %v24_v14 = vld [vmem:[%s2505_s0] sm:$0xff] }
   0x6   :  { %128 = vmatpush.msra.mxu2 %v1868_v4  ;;  %148 = vmatpush.msra.mxu3 %v1873_v5  ;;  %v1919_v15 = vld [vmem:[%s2507_s2 + $0x20] sm:$0xff]  ;;  %v1924_v16 = vld [vmem:[%s2507_s2 + $0x28] sm:$0xff] }
   0x7   :  { %58 = vmatpush.msra.mxu0 %v26_v10  ;;  %81 = vmatpush.msra.mxu1 %v27_v11 }
   0x8   :  { %129 = vmatpush.msra.mxu2 %v1886_v8  ;;  %149 = vmatpush.msra.mxu3 %v1891_v9 }
   0x9   :  { %1548 = vmatmul.msk.f32.vlgmr.msra.gmra.mxu0 %vm36_vm0, %v24_v14  ;;  %1550 = vmatmul.msk.f32.vlgmr.msra.gmra.mxu1 %vm36_vm0, %v24_v14 }
   0xa   :  { %11 = vsyncpa [#allocation3], 0  ;;  %130 = vmatpush.msra.mxu2 %v1904_v12  ;;  %150 = vmatpush.msra.mxu3 %v1909_v13  ;;  %v1933_v17 = vld [vmem:[%s2507_s2 + $0x10] sm:$0xff]  ;;  %v1938_v18 = vld [vmem:[%s2507_s2 + $0x18] sm:$0xff]  ;;  %v1805_v22 = vmov 0.0   ;;  %v105_v51 = vlaneseq  ;;  %s1807_s9 = smov [#allocation2]  }
   0xb   :  { %315 = vmatpush.msrb.mxu1 %v1851_v1  ;;  %295 = vmatpush.msrb.mxu0 %v1846_v0  ;;  %v1947_v19 = vld [vmem:[%s2507_s2] sm:$0xff]  ;;  %v1952_v20 = vld [vmem:[%s2507_s2 + $0x8] sm:$0xff]  ;;  %s1539_s12 = sshll.u32 %s2511_s6, 4  ;;  %s1540_s12 = int_to_ptr.hbm [resolvable:$true] %s1539_s12 }
   0xc   :  { %131 = vmatpush.msra.mxu2 %v1919_v15  ;;  %151 = vmatpush.msra.mxu3 %v1924_v16  ;;  %v25_v21 = vld [vmem:[%s2505_s0 + $0x8] sm:$0xff]  ;;  %v30_v25 = vld [vmem:[%s2508_s3] sm:$0x3]  ;;  %v106_v55 = vand.u32 127, %v105_v51  ;;  %s1806_s3 = smov 64  }
   0xd   :  { %316 = vmatpush.msrb.mxu1 %v1863_v3  ;;  %296 = vmatpush.msrb.mxu0 %v1856_v2  ;;  %v32_v26 = vperm.slane %v30_v25, 0  ;;  %v33_v27 = vperm.slane %v30_v25, 1 }
   0xe   :  { %132 = vmatpush.msra.mxu2 %v1933_v17  ;;  %152 = vmatpush.msra.mxu3 %v1938_v18  ;;  %v2049_v60 = vadd.s32 128, %v106_v55 }
   0xf   :  { %317 = vmatpush.msrb.mxu1 %v1873_v5  ;;  %297 = vmatpush.msrb.mxu0 %v1868_v4 }
  0x10   :  { %133 = vmatpush.msra.mxu2 %v1947_v19  ;;  %153 = vmatpush.msra.mxu3 %v1952_v20 }
  0x11   :  { %134 = vmatmul.f32.vlgmr.msra.gmra.mxu2 %v1805_v22  ;;  %154 = vmatmul.f32.vlgmr.msra.gmra.mxu3 %v1805_v22 }
  0x12   :  { %1549 = vmatmul.msk.f32.gmra.mxu0 %vm36_vm0, %v25_v21  ;;  %1551 = vmatmul.msk.f32.gmra.mxu1 %vm36_vm0, %v25_v21  ;;  %vm255_vm0 = vcmask 1041409  }
  0x13   :  { %318 = vmatpush.msrb.mxu1 %v1891_v9  ;;  %298 = vmatpush.msrb.mxu0 %v1886_v8 }
  0x14   :  { %463 = vmatpush.msrb.mxu2 %v1846_v0  ;;  %483 = vmatpush.msrb.mxu3 %v1851_v1 }
  0x15   :  { %319 = vmatpush.msrb.mxu1 %v1909_v13  ;;  %299 = vmatpush.msrb.mxu0 %v1904_v12 }
  0x16   :  { %464 = vmatpush.msrb.mxu2 %v1856_v2  ;;  %484 = vmatpush.msrb.mxu3 %v1863_v3 }
  0x17   :  { %320 = vmatpush.msrb.mxu1 %v1924_v16  ;;  %300 = vmatpush.msrb.mxu0 %v1919_v15 }
  0x18   :  { %465 = vmatpush.msrb.mxu2 %v1868_v4  ;;  %485 = vmatpush.msrb.mxu3 %v1873_v5 }
  0x19   :  { %321 = vmatpush.msrb.mxu1 %v1938_v18  ;;  %301 = vmatpush.msrb.mxu0 %v1933_v17 }
  0x1a   :  { %466 = vmatpush.msrb.mxu2 %v1886_v8  ;;  %486 = vmatpush.msrb.mxu3 %v1891_v9 }
  0x1b   :  { %322 = vmatpush.msrb.mxu1 %v1952_v20  ;;  %302 = vmatpush.msrb.mxu0 %v1947_v19 }
  0x1c   :  { %467 = vmatpush.msrb.mxu2 %v1904_v12  ;;  %487 = vmatpush.msrb.mxu3 %v1909_v13 }
  0x1d   :  { %637 = vmatpush.msra.mxu0 %v1846_v0  ;;  %657 = vmatpush.msra.mxu1 %v1851_v1 }
  0x1e   :  { %468 = vmatpush.msrb.mxu2 %v1919_v15  ;;  %488 = vmatpush.msrb.mxu3 %v1924_v16 }
  0x1f   :  { %638 = vmatpush.msra.mxu0 %v1856_v2  ;;  %658 = vmatpush.msra.mxu1 %v1863_v3 }
  0x20   :  { %469 = vmatpush.msrb.mxu2 %v1933_v17  ;;  %489 = vmatpush.msrb.mxu3 %v1938_v18 }
  0x21   :  { %639 = vmatpush.msra.mxu0 %v1868_v4  ;;  %659 = vmatpush.msra.mxu1 %v1873_v5 }
  0x22   :  { %470 = vmatpush.msrb.mxu2 %v1947_v19  ;;  %490 = vmatpush.msrb.mxu3 %v1952_v20 }
  0x23   :  { %640 = vmatpush.msra.mxu0 %v1886_v8  ;;  %660 = vmatpush.msra.mxu1 %v1891_v9 }
  0x24   :  { %811 = vmatpush.msra.mxu2 %v1846_v0  ;;  %831 = vmatpush.msra.mxu3 %v1851_v1 }
  0x25   :  { %641 = vmatpush.msra.mxu0 %v1904_v12  ;;  %661 = vmatpush.msra.mxu1 %v1909_v13 }
  0x26   :  { %812 = vmatpush.msra.mxu2 %v1856_v2  ;;  %832 = vmatpush.msra.mxu3 %v1863_v3 }
  0x27   :  { %642 = vmatpush.msra.mxu0 %v1919_v15  ;;  %662 = vmatpush.msra.mxu1 %v1924_v16 }
  0x28   :  { %813 = vmatpush.msra.mxu2 %v1868_v4  ;;  %833 = vmatpush.msra.mxu3 %v1873_v5 }
  0x29   :  { %643 = vmatpush.msra.mxu0 %v1933_v17  ;;  %663 = vmatpush.msra.mxu1 %v1938_v18 }
  0x2a   :  { %814 = vmatpush.msra.mxu2 %v1886_v8  ;;  %834 = vmatpush.msra.mxu3 %v1891_v9 }
  0x2b   :  { %644 = vmatpush.msra.mxu0 %v1947_v19  ;;  %664 = vmatpush.msra.mxu1 %v1952_v20 }
  0x2c   :  { %815 = vmatpush.msra.mxu2 %v1904_v12  ;;  %835 = vmatpush.msra.mxu3 %v1909_v13 }
  0x2e   :  { %816 = vmatpush.msra.mxu2 %v1919_v15  ;;  %836 = vmatpush.msra.mxu3 %v1924_v16 }
  0x30   :  { %817 = vmatpush.msra.mxu2 %v1933_v17  ;;  %837 = vmatpush.msra.mxu3 %v1938_v18 }
  0x32   :  { %818 = vmatpush.msra.mxu2 %v1947_v19  ;;  %838 = vmatpush.msra.mxu3 %v1952_v20 }
  0x86   :  { %v60_v23 = vpop.f32.mrf.mxu0  ;;  %v83_v24 = vpop.f32.mrf.mxu1 }
  0x87   :  { %v2028_v30 = vadd.f32 %v60_v23, %v32_v26  ;;  %v2030_v31 = vadd.f32 %v83_v24, %v33_v27 }
  0x8f   :  { %v63_v28 = vpop.f32.mrf.mxu0  ;;  %v86_v29 = vpop.f32.mrf.mxu1 }
  0x90   :  { %v2032_v32 = vadd.f32 %v63_v28, %v32_v26  ;;  %v2034_v33 = vadd.f32 %v86_v29, %v33_v27 }
  0x94   :  { %v135_v34 = vpop.f32.mrf.mxu2  ;;  %v155_v35 = vpop.f32.mrf.mxu3 }
  0x95   :  { %v160_v36 = vrot.slane %v135_v34, 1  ;;  %v166_v37 = vadd.f32 %v135_v34, %v2028_v30  ;;  %v161_v38 = vrot.slane %v155_v35, 1  ;;  %v167_v39 = vadd.f32 %v155_v35, %v2030_v31 }
  0x97   :  { %v168_v40 = vadd.f32 %v160_v36, %v2032_v32  ;;  %v1552_v41 = vmul.f32 -1.442695, %v166_v37  ;;  %v169_v42 = vadd.f32 %v161_v38, %v2034_v33  ;;  %v1553_v43 = vmul.f32 -1.442695, %v167_v39 }
  0x99   :  { %1603 = vpow2.f32 %v1552_v41  ;;  %v1554_v44 = vmul.f32 -1.442695, %v168_v40  ;;  %v1555_v45 = vmul.f32 -1.442695, %v169_v42 }
  0x9b   :  { %1605 = vpow2.f32 %v1554_v44 }
  0x9c   :  { %1607 = vpow2.f32 %v1553_v43 }
  0x9d   :  { %1609 = vpow2.f32 %v1555_v45 }
  0x9e   :  { %1611 = vtanh.f32 %v169_v42 }
  0x9f   :  { %v1604_v46 = vpop.eup %1603 }
  0xa0   :  { %v2040_v47 = vadd.f32 1.0, %v1604_v46 }
  0xa1   :  { %v1606_v48 = vpop.eup %1605 }
  0xa2   :  { %v1608_v49 = vpop.eup %1607  ;;  %v188_v50 = vadd.f32 1.0, %v1606_v48  ;;  %1613 = vrcp.f32 %v2040_v47  ;;  %vm195_vm1 = vweird.f32 %v2040_v47  ;;  %v199_v10 = vand.u32 2147483647, %v2040_v47 }
  0xa3   :  { %v1610_v52 = vpop.eup %1609  ;;  %v2043_v53 = vadd.f32 1.0, %v1608_v49  ;;  %v201_v11 = vand.u32 2147483648, %v2040_v47 }
  0xa4   :  { %1615 = vrcp.f32 %v188_v50  ;;  %v189_v54 = vadd.f32 1.0, %v1610_v52  ;;  %v2046_v56 = vpop.eup %1611  ;;  %vm225_vm2 = vweird.f32 %v188_v50  ;;  %v231_v25 = vand.u32 2147483648, %v188_v50 }
  0xa5   :  { %1617 = vrcp.f32 %v2043_v53  ;;  %v257_v62 = vrot.slane %v2046_v56, 7  ;;  %vm210_vm4 = vweird.f32 %v2043_v53  ;;  %v229_v27 = vand.u32 2147483647, %v188_v50 }
  0xa6   :  { %1619 = vrcp.f32 %v189_v54  ;;  %v246_v35 = vand.u32 2147483648, %v189_v54  ;;  %v244_v40 = vand.u32 2147483647, %v189_v54  ;;  %v214_v42 = vand.u32 2147483647, %v2043_v53 }
  0xa7   :  { %1621 = vtanh.f32 %v167_v39  ;;  %v216_v43 = vand.u32 2147483648, %v2043_v53  ;;  %v232_v44 = vor.u32 1.1754944e-38, %v231_v25  ;;  %vm230_vm11 = vcmp.eq.f32.partialorder %v229_v27, 8.507059e+37 }
  0xa8   :  { %v1614_v57 = vpop.eup %1613  ;;  %vm240_vm12 = vweird.f32 %v189_v54  ;;  %v202_v49 = vor.u32 1.1754944e-38, %v201_v11  ;;  %vm245_vm14 = vcmp.eq.f32.partialorder %v244_v40, 8.507059e+37  ;;  %vm200_vm15 = vcmp.eq.f32.partialorder %v199_v10, 8.507059e+37 }
  0xa9   :  { %v191_v58 = vmul.f32 %v1614_v57, %v2040_v47  ;;  %vm196_vm3 = vweird.f32 %v1614_v57  ;;  %v217_v56 = vor.u32 1.1754944e-38, %v216_v43 }
  0xaa   :  { %v1616_v59 = vpop.eup %1615  ;;  %vm2059_vm7 = vmor %vm195_vm1, %vm196_vm3  ;;  %vm111_vm1 = vcmp.lt.s32.totalorder %v2049_v60, 192  ;;  %vm2512_vm3 = vcmask 523264   ;;  %v1498_v60 = vld [vmem:[%s2509_s4 + $0x20] sm:$0xff] }
  0xab   :  { %v1618_v61 = vpop.eup %1617  ;;  %v192_v63 = vsub.f32 1.0, %v191_v58  ;;  %v221_v6 = vmul.f32 %v1616_v59, %v188_v50  ;;  %vm226_vm5 = vweird.f32 %v1616_v59  ;;  %v247_v50 = vor.u32 1.1754944e-38, %v246_v35 }
  0xac   :  { %v1620_v7 = vpop.eup %1619  ;;  %v206_v14 = vmul.f32 %v1618_v61, %v2043_v53  ;;  %vm211_vm6 = vweird.f32 %v1618_v61  ;;  %vm227_vm9 = vmor %vm225_vm2, %vm226_vm5  ;;  %vm215_vm2 = vcmp.eq.f32.partialorder %v214_v42, 8.507059e+37 }
  0xad   :  { %v236_v21 = vmul.f32 %v1620_v7, %v189_v54  ;;  %v193_v22 = vmul.f32 %v1614_v57, %v192_v63  ;;  %v222_v23 = vsub.f32 1.0, %v221_v6  ;;  %v1622_v36 = vpop.eup %1621  ;;  %vm241_vm8 = vweird.f32 %v1620_v7  ;;  %vm2069_vm10 = vmor %vm210_vm4, %vm211_vm6 }
  0xae   :  { %v207_v24 = vsub.f32 1.0, %v206_v14  ;;  %vm242_vm13 = vmor %vm240_vm12, %vm241_vm8  ;;  %v258_v6 = vsel %vm255_vm0, %v257_v62, %v1622_v36 }
  0xaf   :  { %v223_v26 = vmul.f32 %v1616_v59, %v222_v23  ;;  %v237_v28 = vsub.f32 1.0, %v236_v21  ;;  %v194_v29 = vadd.f32 %v1614_v57, %v193_v22 }
  0xb0   :  { %v208_v34 = vmul.f32 %v1618_v61, %v207_v24 }
  0xb1   :  { %v224_v38 = vadd.f32 %v1616_v59, %v223_v26  ;;  %v238_v39 = vmul.f32 %v1620_v7, %v237_v28  ;;  %v198_v48 = vsel %vm2059_vm7, %v1614_v57, %v194_v29 }
  0xb2   :  { %v209_v41 = vadd.f32 %v1618_v61, %v208_v34  ;;  %v203_v54 = vsel %vm200_vm15, %v202_v49, %v198_v48 }
  0xb3   :  { %v228_v46 = vsel %vm227_vm9, %v1616_v59, %v224_v38  ;;  %v239_v47 = vadd.f32 %v1620_v7, %v238_v39 }
  0xb4   :  { %v233_v51 = vsel %vm230_vm11, %v232_v44, %v228_v46  ;;  %v213_v52 = vsel %vm2069_vm10, %v1618_v61, %v209_v41 }
  0xb5   :  { %v243_v53 = vsel %vm242_vm13, %v1620_v7, %v239_v47  ;;  %v265_v55 = vrot.slane %v233_v51, 7  ;;  %v218_v59 = vsel %vm215_vm2, %v217_v56, %v213_v52 }
  0xb6   :  { %v248_v58 = vsel %vm245_vm14, %v247_v50, %v243_v53 }
  0xb7   :  { %v267_v57 = vrot.slane %v248_v58, 7  ;;  %v266_v63 = vsel %vm255_vm0, %v265_v55, %v203_v54 }
  0xb8   :  { %v273_v10 = vmul.f32 0.0, %v266_v63 }
  0xb9   :  { %v268_v11 = vsel %vm255_vm0, %v267_v57, %v218_v59 }
  0xba   :  { %v272_v61 = vsel %vm111_vm1, %v258_v6, %v268_v11 }
  0xbb   :  { %v274_v7 = vmul.f32 %v272_v61, %v266_v63 }
  0xbd   :  { %276 = vrot.lane.b32.xlu0 %v274_v7, %s1806_s3 }
 0x12f   :  { %v277_v14 = vpop.permute.xlu0 %276 }
 0x130   :  { %v2085_v21 = vadd.f32 %v277_v14, %v273_v10 }
 0x132   :  { %1623 = vtanh.f32 %v2085_v21 }
 0x138   :  { %v1624_v22 = vpop.eup %1623 }
 0x139   :  { %v281_v23 = vmul.f32 %v1624_v22, %v272_v61 }
 0x13b   :  { %283 = vrot.lane.b32.xlu0 %v281_v23, %s1806_s3 }
 0x1ad   :  { %v284_v62 = vpop.permute.xlu0 %283 }
 0x1ae   :  { %1556 = vmatmul.msk.f32.vlgmr.msrb.gmra.mxu0 %vm2512_vm3, %v284_v62  ;;  %1557 = vmatmul.msk.f32.vlgmr.msrb.gmra.mxu1 %vm2512_vm3, %v284_v62 }
 0x1af   :  { %985 = vmatpush.msrb.mxu0 %v1846_v0  ;;  %1005 = vmatpush.msrb.mxu1 %v1851_v1 }
 0x1b1   :  { %986 = vmatpush.msrb.mxu0 %v1856_v2  ;;  %1006 = vmatpush.msrb.mxu1 %v1863_v3 }
 0x1b3   :  { %987 = vmatpush.msrb.mxu0 %v1868_v4  ;;  %1007 = vmatpush.msrb.mxu1 %v1873_v5 }
 0x1b5   :  { %988 = vmatpush.msrb.mxu0 %v1886_v8  ;;  %1008 = vmatpush.msrb.mxu1 %v1891_v9 }
 0x1b7   :  { %989 = vmatpush.msrb.mxu0 %v1904_v12  ;;  %1009 = vmatpush.msrb.mxu1 %v1909_v13 }
 0x1b9   :  { %990 = vmatpush.msrb.mxu0 %v1919_v15  ;;  %1010 = vmatpush.msrb.mxu1 %v1924_v16 }
 0x1bb   :  { %991 = vmatpush.msrb.mxu0 %v1933_v17  ;;  %1011 = vmatpush.msrb.mxu1 %v1938_v18 }
 0x1bd   :  { %992 = vmatpush.msrb.mxu0 %v1947_v19  ;;  %1012 = vmatpush.msrb.mxu1 %v1952_v20 }
 0x22b   :  { %v304_v24 = vpop.f32.mrf.mxu0  ;;  %v324_v25 = vpop.f32.mrf.mxu1 }
 0x22c   :  { %v329_v26 = vrot.slane %v304_v24, 7  ;;  %v337_v27 = vadd.f32 %v304_v24, %v2032_v32  ;;  %v330_v28 = vrot.slane %v324_v25, 7  ;;  %v338_v29 = vadd.f32 %v324_v25, %v2034_v33 }
 0x22e   :  { %v335_v34 = vadd.f32 %v329_v26, %v2028_v30  ;;  %v1560_v35 = vmul.f32 -1.442695, %v337_v27  ;;  %v336_v36 = vadd.f32 %v330_v28, %v2030_v31  ;;  %v1561_v39 = vmul.f32 -1.442695, %v338_v29 }
 0x230   :  { %v1558_v37 = vmul.f32 -1.442695, %v335_v34  ;;  %1625 = vpow2.f32 %v1560_v35  ;;  %v1559_v38 = vmul.f32 -1.442695, %v336_v36 }
 0x232   :  { %1627 = vpow2.f32 %v1558_v37 }
 0x233   :  { %1629 = vpow2.f32 %v1559_v38 }
 0x234   :  { %1631 = vpow2.f32 %v1561_v39 }
 0x235   :  { %1633 = vtanh.f32 %v336_v36 }
 0x236   :  { %v1626_v40 = vpop.eup %1625 }
 0x237   :  { %v2111_v41 = vadd.f32 1.0, %v1626_v40 }
 0x238   :  { %v1628_v42 = vpop.eup %1627 }
 0x239   :  { %v1630_v43 = vpop.eup %1629  ;;  %v355_v44 = vadd.f32 1.0, %v1628_v42  ;;  %1635 = vrcp.f32 %v2111_v41  ;;  %vm394_vm4 = vweird.f32 %v2111_v41  ;;  %v398_v58 = vand.u32 2147483647, %v2111_v41 }
 0x23a   :  { %v1632_v45 = vpop.eup %1631  ;;  %v356_v46 = vadd.f32 1.0, %v1630_v43  ;;  %v400_v54 = vand.u32 2147483648, %v2111_v41 }
 0x23b   :  { %1637 = vrcp.f32 %v355_v44  ;;  %v2114_v47 = vadd.f32 1.0, %v1632_v45  ;;  %v2117_v48 = vpop.eup %1633  ;;  %vm364_vm5 = vweird.f32 %v355_v44  ;;  %v368_v63 = vand.u32 2147483647, %v355_v44 }
 0x23c   :  { %1639 = vrcp.f32 %v356_v46  ;;  %v425_v52 = vrot.slane %v2117_v48, 1  ;;  %v370_v6 = vand.u32 2147483648, %v355_v44  ;;  %vm379_vm6 = vweird.f32 %v356_v46 }
 0x23d   :  { %1641 = vrcp.f32 %v2114_v47  ;;  %v383_v14 = vand.u32 2147483647, %v356_v46  ;;  %v385_v22 = vand.u32 2147483648, %v356_v46  ;;  %vm2125_vm9 = vcmp.eq.f32.partialorder %v368_v63, 8.507059e+37 }
 0x23e   :  { %1643 = vtanh.f32 %v338_v29  ;;  %vm2129_vm11 = vcmp.eq.f32.partialorder %v398_v58, 8.507059e+37  ;;  %v415_v36 = vand.u32 2147483648, %v2114_v47  ;;  %v371_v37 = vor.u32 1.1754944e-38, %v370_v6 }
 0x23f   :  { %v1636_v49 = vpop.eup %1635  ;;  %vm409_vm15 = vweird.f32 %v2114_v47  ;;  %v413_v39 = vand.u32 2147483647, %v2114_v47 }
 0x240   :  { %v390_v51 = vmul.f32 %v1636_v49, %v2111_v41  ;;  %vm395_vm7 = vweird.f32 %v1636_v49  ;;  %v386_v41 = vor.u32 1.1754944e-38, %v385_v22 }
 0x241   :  { %v1638_v50 = vpop.eup %1637  ;;  %vm2135_vm12 = vmor %vm394_vm4, %vm395_vm7  ;;  %vm384_vm4 = vcmp.eq.f32.partialorder %v383_v14, 8.507059e+37 }
 0x242   :  { %v1640_v53 = vpop.eup %1639  ;;  %v360_v55 = vmul.f32 %v1638_v50, %v355_v44  ;;  %v391_v56 = vsub.f32 1.0, %v390_v51  ;;  %vm365_vm8 = vweird.f32 %v1638_v50  ;;  %v401_v44 = vor.u32 1.1754944e-38, %v400_v54 }
 0x243   :  { %v1642_v57 = vpop.eup %1641  ;;  %v375_v59 = vmul.f32 %v1640_v53, %v356_v46  ;;  %vm380_vm10 = vweird.f32 %v1640_v53  ;;  %vm366_vm14 = vmor %vm364_vm5, %vm365_vm8 }
 0x244   :  { %v361_v11 = vsub.f32 1.0, %v360_v55  ;;  %v392_v61 = vmul.f32 %v1636_v49, %v391_v56  ;;  %v405_v7 = vmul.f32 %v1642_v57, %v2114_v47  ;;  %v1644_v25 = vpop.eup %1643  ;;  %vm410_vm13 = vweird.f32 %v1642_v57  ;;  %vm381_vm2 = vmor %vm379_vm6, %vm380_vm10 }
 0x245   :  { %v376_v10 = vsub.f32 1.0, %v375_v59  ;;  %vm411_vm5 = vmor %vm409_vm15, %vm410_vm13  ;;  %v416_v56 = vor.u32 1.1754944e-38, %v415_v36  ;;  %vm414_vm6 = vcmp.eq.f32.partialorder %v413_v39, 8.507059e+37  ;;  %v426_v59 = vsel %vm255_vm0, %v1644_v25, %v425_v52 }
 0x246   :  { %v362_v23 = vmul.f32 %v1638_v50, %v361_v11  ;;  %v393_v62 = vadd.f32 %v1636_v49, %v392_v61  ;;  %v406_v24 = vsub.f32 1.0, %v405_v7 }
 0x247   :  { %v377_v27 = vmul.f32 %v1640_v53, %v376_v10 }
 0x248   :  { %v363_v29 = vadd.f32 %v1638_v50, %v362_v23  ;;  %v407_v35 = vmul.f32 %v1642_v57, %v406_v24  ;;  %v397_v42 = vsel %vm2135_vm12, %v1636_v49, %v393_v62 }
 0x249   :  { %v378_v38 = vadd.f32 %v1640_v53, %v377_v27  ;;  %v402_v46 = vsel %vm2129_vm11, %v401_v44, %v397_v42 }
 0x24a   :  { %v367_v40 = vsel %vm366_vm14, %v1638_v50, %v363_v29  ;;  %v408_v43 = vadd.f32 %v1642_v57, %v407_v35 }
 0x24b   :  { %v372_v45 = vsel %vm2125_vm9, %v371_v37, %v367_v40  ;;  %v382_v48 = vsel %vm381_vm2, %v1640_v53, %v378_v38 }
 0x24c   :  { %v387_v51 = vsel %vm384_vm4, %v386_v41, %v382_v48  ;;  %v412_v55 = vsel %vm411_vm5, %v1642_v57, %v408_v43  ;;  %v433_v47 = vrot.slane %v372_v45, 1 }
 0x24d   :  { %v435_v50 = vrot.slane %v387_v51, 1  ;;  %v417_v58 = vsel %vm414_vm6, %v416_v56, %v412_v55 }
 0x24e   :  { %v434_v49 = vsel %vm255_vm0, %v402_v46, %v433_v47 }
 0x24f   :  { %v436_v53 = vsel %vm255_vm0, %v417_v58, %v435_v50  ;;  %v441_v57 = vmul.f32 %v434_v49, %v2085_v21 }
 0x250   :  { %v440_v54 = vsel %vm111_vm1, %v426_v59, %v436_v53 }
 0x251   :  { %v442_v63 = vmul.f32 %v440_v54, %v434_v49 }
 0x253   :  { %444 = vrot.lane.b32.xlu1 %v442_v63, %s1806_s3 }
 0x2c5   :  { %v445_v6 = vpop.permute.xlu1 %444 }
 0x2c6   :  { %v2158_v11 = vadd.f32 %v445_v6, %v441_v57 }
 0x2c8   :  { %1645 = vtanh.f32 %v2158_v11 }
 0x2ce   :  { %v1646_v61 = vpop.eup %1645 }
 0x2cf   :  { %v449_v7 = vmul.f32 %v1646_v61, %v440_v54 }
 0x2d1   :  { %451 = vrot.lane.b32.xlu1 %v449_v7, %s1806_s3 }
 0x343   :  { %v452_v52 = vpop.permute.xlu1 %451 }
 0x344   :  { %1562 = vmatmul.msk.f32.vlgmr.msrb.gmra.mxu2 %vm2512_vm3, %v452_v52  ;;  %1563 = vmatmul.msk.f32.vlgmr.msrb.gmra.mxu3 %vm2512_vm3, %v452_v52 }
 0x345   :  { %1159 = vmatpush.msrb.mxu2 %v1846_v0  ;;  %1179 = vmatpush.msrb.mxu3 %v1851_v1 }
 0x347   :  { %1160 = vmatpush.msrb.mxu2 %v1856_v2  ;;  %1180 = vmatpush.msrb.mxu3 %v1863_v3 }
 0x349   :  { %1161 = vmatpush.msrb.mxu2 %v1868_v4  ;;  %1181 = vmatpush.msrb.mxu3 %v1873_v5 }
 0x34b   :  { %1162 = vmatpush.msrb.mxu2 %v1886_v8  ;;  %1182 = vmatpush.msrb.mxu3 %v1891_v9 }
 0x34d   :  { %1163 = vmatpush.msrb.mxu2 %v1904_v12  ;;  %1183 = vmatpush.msrb.mxu3 %v1909_v13 }
 0x34f   :  { %1164 = vmatpush.msrb.mxu2 %v1919_v15  ;;  %1184 = vmatpush.msrb.mxu3 %v1924_v16 }
 0x351   :  { %1165 = vmatpush.msrb.mxu2 %v1933_v17  ;;  %1185 = vmatpush.msrb.mxu3 %v1938_v18 }
 0x353   :  { %1166 = vmatpush.msrb.mxu2 %v1947_v19  ;;  %1186 = vmatpush.msrb.mxu3 %v1952_v20 }
 0x3c7   :  { %v472_v21 = vpop.f32.mrf.mxu2  ;;  %v492_v10 = vpop.f32.mrf.mxu3 }
 0x3c8   :  { %v497_v14 = vrot.slane %v472_v21, 6  ;;  %v499_v22 = vrot.slane %v472_v21, 7  ;;  %v498_v23 = vrot.slane %v492_v10, 6  ;;  %v500_v62 = vrot.slane %v492_v10, 7 }
 0x3ca   :  { %v505_v24 = vadd.f32 %v497_v14, %v2028_v30  ;;  %v507_v25 = vadd.f32 %v499_v22, %v2032_v32  ;;  %v506_v26 = vadd.f32 %v498_v23, %v2030_v31  ;;  %v508_v27 = vadd.f32 %v500_v62, %v2034_v33 }
 0x3cc   :  { %v1564_v28 = vmul.f32 -1.442695, %v505_v24  ;;  %v1566_v29 = vmul.f32 -1.442695, %v507_v25  ;;  %v1565_v34 = vmul.f32 -1.442695, %v506_v26 }
 0x3cd   :  { %v1567_v35 = vmul.f32 -1.442695, %v508_v27 }
 0x3ce   :  { %1647 = vpow2.f32 %v1564_v28 }
 0x3cf   :  { %1649 = vpow2.f32 %v1566_v29 }
 0x3d0   :  { %1651 = vpow2.f32 %v1565_v34 }
 0x3d1   :  { %1653 = vpow2.f32 %v1567_v35 }
 0x3d2   :  { %1655 = vtanh.f32 %v506_v26 }
 0x3d3   :  { %1657 = vtanh.f32 %v508_v27 }
 0x3d4   :  { %v1648_v36 = vpop.eup %1647 }
 0x3d5   :  { %v1650_v37 = vpop.eup %1649  ;;  %v525_v38 = vadd.f32 1.0, %v1648_v36 }
 0x3d6   :  { %v1652_v39 = vpop.eup %1651  ;;  %v527_v40 = vadd.f32 1.0, %v1650_v37 }
 0x3d7   :  { %v1654_v41 = vpop.eup %1653  ;;  %1659 = vrcp.f32 %v525_v38  ;;  %v526_v42 = vadd.f32 1.0, %v1652_v39  ;;  %v538_v44 = vand.u32 2147483647, %v525_v38  ;;  %v540_v51 = vand.u32 2147483648, %v525_v38 }
 0x3d8   :  { %1661 = vrcp.f32 %v527_v40  ;;  %v2184_v43 = vadd.f32 1.0, %v1654_v41  ;;  %v2186_v45 = vpop.eup %1655  ;;  %vm534_vm7 = vweird.f32 %v525_v38  ;;  %vm564_vm10 = vweird.f32 %v527_v40 }
 0x3d9   :  { %1663 = vrcp.f32 %v526_v42  ;;  %v2189_v48 = vpop.eup %1657  ;;  %v553_v56 = vand.u32 2147483647, %v526_v42  ;;  %v596_v46 = vrot.slane %v2186_v45, 2  ;;  %vm2193_vm8 = vcmp.eq.f32.partialorder %v538_v44, 8.507059e+37 }
 0x3da   :  { %1665 = vrcp.f32 %v2184_v43  ;;  %v597_v50 = vrot.slane %v2189_v48, 1  ;;  %vm549_vm9 = vweird.f32 %v526_v42  ;;  %v541_v6 = vor.u32 1.1754944e-38, %v540_v51 }
 0x3db   :  { %v555_v61 = vand.u32 2147483648, %v526_v42  ;;  %vm2198_vm11 = vcmp.eq.f32.partialorder %v553_v56, 8.507059e+37  ;;  %v568_v10 = vand.u32 2147483647, %v527_v40  ;;  %v570_v23 = vand.u32 2147483648, %v527_v40 }
 0x3dc   :  { %vm579_vm14 = vweird.f32 %v2184_v43  ;;  %v585_v27 = vand.u32 2147483648, %v2184_v43  ;;  %v583_v34 = vand.u32 2147483647, %v2184_v43 }
 0x3dd   :  { %v1660_v55 = vpop.eup %1659  ;;  %v556_v37 = vor.u32 1.1754944e-38, %v555_v61  ;;  %v571_v39 = vor.u32 1.1754944e-38, %v570_v23  ;;  %vm569_vm3 = vcmp.eq.f32.partialorder %v568_v10, 8.507059e+37 }
 0x3de   :  { %v1662_v47 = vpop.eup %1661  ;;  %v530_v58 = vmul.f32 %v1660_v55, %v525_v38  ;;  %vm535_vm12 = vweird.f32 %v1660_v55  ;;  %v586_v51 = vor.u32 1.1754944e-38, %v585_v27 }
 0x3df   :  { %v1664_v49 = vpop.eup %1663  ;;  %v560_v53 = vmul.f32 %v1662_v47, %v527_v40  ;;  %vm565_vm13 = vweird.f32 %v1662_v47  ;;  %vm536_vm2 = vmor %vm534_vm7, %vm535_vm12 }
 0x3e0   :  { %v1666_v54 = vpop.eup %1665  ;;  %v545_v63 = vmul.f32 %v1664_v49, %v526_v42  ;;  %v531_v57 = vsub.f32 1.0, %v530_v58  ;;  %vm550_vm15 = vweird.f32 %v1664_v49  ;;  %vm566_vm5 = vmor %vm564_vm10, %vm565_vm13  ;;  %vm584_vm10 = vcmp.eq.f32.partialorder %v583_v34, 8.507059e+37 }
 0x3e1   :  { %v575_v7 = vmul.f32 %v1666_v54, %v2184_v43  ;;  %v561_v21 = vsub.f32 1.0, %v560_v53  ;;  %vm580_vm4 = vweird.f32 %v1666_v54  ;;  %vm551_vm6 = vmor %vm549_vm9, %vm550_vm15 }
 0x3e2   :  { %v532_v14 = vmul.f32 %v1660_v55, %v531_v57  ;;  %v546_v22 = vsub.f32 1.0, %v545_v63  ;;  %vm581_vm7 = vmor %vm579_vm14, %vm580_vm4  ;;  %v598_v63 = vsel %vm255_vm0, %v597_v50, %v596_v46 }
 0x3e3   :  { %v562_v62 = vmul.f32 %v1662_v47, %v561_v21  ;;  %v576_v24 = vsub.f32 1.0, %v575_v7 }
 0x3e4   :  { %v533_v25 = vadd.f32 %v1660_v55, %v532_v14  ;;  %v547_v26 = vmul.f32 %v1664_v49, %v546_v22 }
 0x3e5   :  { %v563_v28 = vadd.f32 %v1662_v47, %v562_v62  ;;  %v577_v29 = vmul.f32 %v1666_v54, %v576_v24 }
 0x3e6   :  { %v537_v35 = vsel %vm536_vm2, %v1660_v55, %v533_v25  ;;  %v548_v36 = vadd.f32 %v1664_v49, %v547_v26 }
 0x3e7   :  { %v542_v41 = vsel %vm2193_vm8, %v541_v6, %v537_v35  ;;  %v567_v45 = vsel %vm566_vm5, %v1662_v47, %v563_v28  ;;  %v578_v38 = vadd.f32 %v1666_v54, %v577_v29 }
 0x3e8   :  { %v552_v48 = vsel %vm551_vm6, %v1664_v49, %v548_v36  ;;  %v572_v44 = vsel %vm569_vm3, %v571_v39, %v567_v45  ;;  %v605_v55 = vrot.slane %v542_v41, 2  ;;  %vm2527_vm3 = vcmask 523264  }
 0x3e9   :  { %v557_v40 = vsel %vm2198_vm11, %v556_v37, %v552_v48  ;;  %v582_v56 = vsel %vm581_vm7, %v1666_v54, %v578_v38  ;;  %v606_v58 = vrot.slane %v572_v44, 1  ;;  %vm2528_vm8 = vmmov %vm2527_vm3 }
 0x3ea   :  { %v587_v59 = vsel %vm584_vm10, %v586_v51, %v582_v56  ;;  %v608_v53 = vrot.slane %v557_v40, 2 }
 0x3eb   :  { %v609_v42 = vrot.slane %v587_v59, 1  ;;  %v607_v47 = vsel %vm255_vm0, %v606_v58, %v605_v55 }
 0x3ec   :  { %v615_v6 = vmul.f32 %v607_v47, %v2158_v11 }
 0x3ed   :  { %v610_v49 = vsel %vm255_vm0, %v609_v42, %v608_v53 }
 0x3ee   :  { %v614_v43 = vsel %vm111_vm1, %v598_v63, %v610_v49 }
 0x3ef   :  { %v616_v57 = vmul.f32 %v614_v43, %v607_v47 }
 0x3f1   :  { %618 = vrot.lane.b32.xlu2 %v616_v57, %s1806_s3 }
 0x44b   :  { %v619_v54 = vpop.permute.xlu2 %618 }
 0x44c   :  { %v2222_v61 = vadd.f32 %v619_v54, %v615_v6 }
 0x44e   :  { %1667 = vtanh.f32 %v2222_v61 }
 0x454   :  { %v1668_v7 = vpop.eup %1667 }
 0x455   :  { %v623_v52 = vmul.f32 %v1668_v7, %v614_v43 }
 0x457   :  { %625 = vrot.lane.b32.xlu2 %v623_v52, %s1806_s3 }
 0x4b1   :  { %v626_v46 = vpop.permute.xlu2 %625 }
 0x4b2   :  { %1568 = vmatmul.msk.f32.vlgmr.msra.gmra.mxu0 %vm2527_vm3, %v626_v46  ;;  %1569 = vmatmul.msk.f32.vlgmr.msra.gmra.mxu1 %vm2528_vm8, %v626_v46 }
 0x4b3   :  { %1333 = vmatpush.msra.mxu0 %v1846_v0  ;;  %1353 = vmatpush.msra.mxu1 %v1851_v1 }
 0x4b5   :  { %1334 = vmatpush.msra.mxu0 %v1856_v2  ;;  %1354 = vmatpush.msra.mxu1 %v1863_v3 }
 0x4b7   :  { %1335 = vmatpush.msra.mxu0 %v1868_v4  ;;  %1355 = vmatpush.msra.mxu1 %v1873_v5 }
 0x4b9   :  { %1336 = vmatpush.msra.mxu0 %v1886_v8  ;;  %1356 = vmatpush.msra.mxu1 %v1891_v9 }
 0x4bb   :  { %1337 = vmatpush.msra.mxu0 %v1904_v12  ;;  %1357 = vmatpush.msra.mxu1 %v1909_v13 }
 0x4bd   :  { %1338 = vmatpush.msra.mxu0 %v1919_v15  ;;  %1358 = vmatpush.msra.mxu1 %v1924_v16 }
 0x4bf   :  { %1339 = vmatpush.msra.mxu0 %v1933_v17  ;;  %1359 = vmatpush.msra.mxu1 %v1938_v18 }
 0x4c1   :  { %1340 = vmatpush.msra.mxu0 %v1947_v19  ;;  %1360 = vmatpush.msra.mxu1 %v1952_v20 }
 0x52f   :  { %v646_v0 = vpop.f32.mrf.mxu0  ;;  %v666_v1 = vpop.f32.mrf.mxu1 }
 0x530   :  { %v671_v2 = vrot.slane %v646_v0, 5  ;;  %v673_v3 = vrot.slane %v646_v0, 6  ;;  %v672_v4 = vrot.slane %v666_v1, 5  ;;  %v674_v5 = vrot.slane %v666_v1, 6 }
 0x532   :  { %v679_v8 = vadd.f32 %v671_v2, %v2028_v30  ;;  %v681_v9 = vadd.f32 %v673_v3, %v2032_v32  ;;  %v680_v12 = vadd.f32 %v672_v4, %v2030_v31  ;;  %v682_v13 = vadd.f32 %v674_v5, %v2034_v33 }
 0x534   :  { %v1570_v15 = vmul.f32 -1.442695, %v679_v8  ;;  %v1572_v16 = vmul.f32 -1.442695, %v681_v9  ;;  %v1571_v17 = vmul.f32 -1.442695, %v680_v12 }
 0x535   :  { %v1573_v18 = vmul.f32 -1.442695, %v682_v13 }
 0x536   :  { %1669 = vpow2.f32 %v1570_v15 }
 0x537   :  { %1671 = vpow2.f32 %v1572_v16 }
 0x538   :  { %1673 = vpow2.f32 %v1571_v17 }
 0x539   :  { %1675 = vpow2.f32 %v1573_v18 }
 0x53a   :  { %1677 = vtanh.f32 %v680_v12 }
 0x53b   :  { %1679 = vtanh.f32 %v682_v13 }
 0x53c   :  { %v1670_v19 = vpop.eup %1669 }
 0x53d   :  { %v1672_v20 = vpop.eup %1671  ;;  %v699_v11 = vadd.f32 1.0, %v1670_v19 }
 0x53e   :  { %v1674_v50 = vpop.eup %1673  ;;  %v701_v21 = vadd.f32 1.0, %v1672_v20 }
 0x53f   :  { %v1676_v10 = vpop.eup %1675  ;;  %1681 = vrcp.f32 %v699_v11  ;;  %v700_v14 = vadd.f32 1.0, %v1674_v50  ;;  %v712_v24 = vand.u32 2147483647, %v699_v11  ;;  %v714_v25 = vand.u32 2147483648, %v699_v11 }
 0x540   :  { %1683 = vrcp.f32 %v701_v21  ;;  %v2248_v22 = vadd.f32 1.0, %v1676_v10  ;;  %v2250_v23 = vpop.eup %1677  ;;  %vm708_vm9 = vweird.f32 %v699_v11  ;;  %vm738_vm13 = vweird.f32 %v701_v21 }
 0x541   :  { %1685 = vrcp.f32 %v700_v14  ;;  %v2253_v62 = vpop.eup %1679  ;;  %v727_v27 = vand.u32 2147483647, %v700_v14  ;;  %v770_v34 = vrot.slane %v2250_v23, 3  ;;  %vm2257_vm11 = vcmp.eq.f32.partialorder %v712_v24, 8.507059e+37 }
 0x542   :  { %1687 = vrcp.f32 %v2248_v22  ;;  %v771_v35 = vrot.slane %v2253_v62, 2  ;;  %vm723_vm12 = vweird.f32 %v700_v14  ;;  %v715_v48 = vor.u32 1.1754944e-38, %v714_v25 }
 0x543   :  { %v729_v44 = vand.u32 2147483648, %v700_v14  ;;  %vm2262_vm14 = vcmp.eq.f32.partialorder %v727_v27, 8.507059e+37  ;;  %v742_v56 = vand.u32 2147483647, %v701_v21  ;;  %v744_v53 = vand.u32 2147483648, %v701_v21 }
 0x544   :  { %vm753_vm4 = vweird.f32 %v2248_v22  ;;  %v759_v43 = vand.u32 2147483648, %v2248_v22  ;;  %v757_v54 = vand.u32 2147483647, %v2248_v22  ;;  %v772_v20 = vsel %vm255_vm0, %v771_v35, %v770_v34 }
 0x545   :  { %v1682_v26 = vpop.eup %1681  ;;  %v730_v46 = vor.u32 1.1754944e-38, %v729_v44  ;;  %v745_v0 = vor.u32 1.1754944e-38, %v744_v53  ;;  %vm743_vm8 = vcmp.eq.f32.partialorder %v742_v56, 8.507059e+37 }
 0x546   :  { %v1684_v28 = vpop.eup %1683  ;;  %v704_v29 = vmul.f32 %v1682_v26, %v699_v11  ;;  %vm709_vm15 = vweird.f32 %v1682_v26  ;;  %v760_v8 = vor.u32 1.1754944e-38, %v759_v43 }
 0x547   :  { %v1686_v36 = vpop.eup %1685  ;;  %v734_v37 = vmul.f32 %v1684_v28, %v701_v21  ;;  %vm739_vm2 = vweird.f32 %v1684_v28  ;;  %vm710_vm6 = vmor %vm708_vm9, %vm709_vm15 }
 0x548   :  { %v1688_v41 = vpop.eup %1687  ;;  %v705_v45 = vsub.f32 1.0, %v704_v29  ;;  %v719_v38 = vmul.f32 %v1686_v36, %v700_v14  ;;  %vm724_vm5 = vweird.f32 %v1686_v36  ;;  %vm740_vm10 = vmor %vm738_vm13, %vm739_vm2  ;;  %vm758_vm13 = vcmp.eq.f32.partialorder %v757_v54, 8.507059e+37 }
 0x549   :  { %v735_v51 = vsub.f32 1.0, %v734_v37  ;;  %v749_v55 = vmul.f32 %v1688_v41, %v2248_v22  ;;  %vm754_vm7 = vweird.f32 %v1688_v41  ;;  %vm725_vm3 = vmor %vm723_vm12, %vm724_vm5 }
 0x54a   :  { %v720_v58 = vsub.f32 1.0, %v719_v38  ;;  %v706_v59 = vmul.f32 %v1682_v26, %v705_v45  ;;  %vm755_vm9 = vmor %vm753_vm4, %vm754_vm7 }
 0x54b   :  { %v750_v42 = vsub.f32 1.0, %v749_v55  ;;  %v736_v47 = vmul.f32 %v1684_v28, %v735_v51 }
 0x54c   :  { %v707_v63 = vadd.f32 %v1682_v26, %v706_v59  ;;  %v721_v49 = vmul.f32 %v1686_v36, %v720_v58 }
 0x54d   :  { %v737_v57 = vadd.f32 %v1684_v28, %v736_v47  ;;  %v751_v6 = vmul.f32 %v1688_v41, %v750_v42 }
 0x54e   :  { %v711_v7 = vsel %vm710_vm6, %v1682_v26, %v707_v63  ;;  %v722_v52 = vadd.f32 %v1686_v36, %v721_v49 }
 0x54f   :  { %v716_v1 = vsel %vm2257_vm11, %v715_v48, %v711_v7  ;;  %v741_v2 = vsel %vm740_vm10, %v1684_v28, %v737_v57  ;;  %v752_v3 = vadd.f32 %v1688_v41, %v751_v6  ;;  %vm2533_vm11 = vcmask 523264  }
 0x550   :  { %v726_v4 = vsel %vm725_vm3, %v1686_v36, %v722_v52  ;;  %v746_v5 = vsel %vm743_vm8, %v745_v0, %v741_v2  ;;  %v779_v9 = vrot.slane %v716_v1, 3  ;;  %vm2534_vm12 = vmmov %vm2533_vm11 }
 0x551   :  { %v731_v12 = vsel %vm2262_vm14, %v730_v46, %v726_v4  ;;  %v756_v13 = vsel %vm755_vm9, %v1688_v41, %v752_v3  ;;  %v780_v15 = vrot.slane %v746_v5, 2 }
 0x552   :  { %v761_v16 = vsel %vm758_vm13, %v760_v8, %v756_v13  ;;  %v782_v17 = vrot.slane %v731_v12, 3 }
 0x553   :  { %v783_v18 = vrot.slane %v761_v16, 2  ;;  %v781_v19 = vsel %vm255_vm0, %v780_v15, %v779_v9 }
 0x554   :  { %v789_v10 = vmul.f32 %v781_v19, %v2222_v61 }
 0x555   :  { %v784_v11 = vsel %vm255_vm0, %v783_v18, %v782_v17 }
 0x556   :  { %v788_v50 = vsel %vm111_vm1, %v772_v20, %v784_v11 }
 0x557   :  { %v790_v21 = vmul.f32 %v788_v50, %v781_v19 }
 0x559   :  { %792 = vrot.lane.b32.xlu0 %v790_v21, %s1806_s3 }
 0x5cb   :  { %v793_v14 = vpop.permute.xlu0 %792 }
 0x5cc   :  { %v2285_v22 = vadd.f32 %v793_v14, %v789_v10 }
 0x5ce   :  { %1689 = vtanh.f32 %v2285_v22 }
 0x5d4   :  { %v1690_v23 = vpop.eup %1689 }
 0x5d5   :  { %v797_v62 = vmul.f32 %v1690_v23, %v788_v50 }
 0x5d7   :  { %799 = vrot.lane.b32.xlu1 %v797_v62, %s1806_s3 }
 0x649   :  { %v800_v24 = vpop.permute.xlu1 %799 }
 0x64a   :  { %1574 = vmatmul.msk.f32.vlgmr.msra.gmra.mxu2 %vm2533_vm11, %v800_v24  ;;  %1575 = vmatmul.msk.f32.vlgmr.msra.gmra.mxu3 %vm2534_vm12, %v800_v24 }
 0x6cd   :  { %v820_v25 = vpop.f32.mrf.mxu2  ;;  %v840_v26 = vpop.f32.mrf.mxu3 }
 0x6ce   :  { %v845_v27 = vrot.slane %v820_v25, 4  ;;  %v847_v28 = vrot.slane %v820_v25, 5  ;;  %v846_v29 = vrot.slane %v840_v26, 4  ;;  %v848_v61 = vrot.slane %v840_v26, 5 }
 0x6d0   :  { %v853_v34 = vadd.f32 %v845_v27, %v2028_v30  ;;  %v855_v35 = vadd.f32 %v847_v28, %v2032_v32  ;;  %v854_v36 = vadd.f32 %v846_v29, %v2030_v31  ;;  %v856_v37 = vadd.f32 %v848_v61, %v2034_v33 }
 0x6d2   :  { %v1576_v39 = vmul.f32 -1.442695, %v853_v34  ;;  %v1578_v41 = vmul.f32 -1.442695, %v855_v35  ;;  %v1577_v45 = vmul.f32 -1.442695, %v854_v36 }
 0x6d3   :  { %v1579_v38 = vmul.f32 -1.442695, %v856_v37 }
 0x6d4   :  { %1691 = vpow2.f32 %v1576_v39 }
 0x6d5   :  { %1693 = vpow2.f32 %v1578_v41 }
 0x6d6   :  { %1695 = vpow2.f32 %v1577_v45 }
 0x6d7   :  { %1697 = vpow2.f32 %v1579_v38 }
 0x6d8   :  { %1699 = vtanh.f32 %v854_v36 }
 0x6d9   :  { %1701 = vtanh.f32 %v856_v37 }
 0x6da   :  { %v1692_v48 = vpop.eup %1691 }
 0x6db   :  { %v1694_v44 = vpop.eup %1693  ;;  %v873_v51 = vadd.f32 1.0, %v1692_v48 }
 0x6dc   :  { %v1696_v55 = vpop.eup %1695  ;;  %v875_v40 = vadd.f32 1.0, %v1694_v44 }
 0x6dd   :  { %v1698_v56 = vpop.eup %1697  ;;  %1703 = vrcp.f32 %v873_v51  ;;  %v874_v58 = vadd.f32 1.0, %v1696_v55  ;;  %v886_v47 = vand.u32 2147483647, %v873_v51  ;;  %v888_v63 = vand.u32 2147483648, %v873_v51 }
 0x6de   :  { %1705 = vrcp.f32 %v875_v40  ;;  %v2295_v59 = vadd.f32 1.0, %v1698_v56  ;;  %v2297_v53 = vpop.eup %1699  ;;  %vm882_vm14 = vweird.f32 %v873_v51  ;;  %vm912_vm4 = vweird.f32 %v875_v40 }
 0x6df   :  { %1707 = vrcp.f32 %v874_v58  ;;  %v2300_v42 = vpop.eup %1701  ;;  %v901_v43 = vand.u32 2147483647, %v874_v58  ;;  %v944_v54 = vrot.slane %v2297_v53, 4  ;;  %vm2304_vm15 = vcmp.eq.f32.partialorder %v886_v47, 8.507059e+37 }
 0x6e0   :  { %1709 = vrcp.f32 %v2295_v59  ;;  %v945_v7 = vrot.slane %v2300_v42, 3  ;;  %vm897_vm2 = vweird.f32 %v874_v58  ;;  %v889_v4 = vor.u32 1.1754944e-38, %v888_v63 }
 0x6e1   :  { %v903_v5 = vand.u32 2147483648, %v874_v58  ;;  %vm2309_vm5 = vcmp.eq.f32.partialorder %v901_v43, 8.507059e+37  ;;  %v916_v13 = vand.u32 2147483647, %v875_v40  ;;  %v918_v17 = vand.u32 2147483648, %v875_v40 }
 0x6e2   :  { %vm927_vm10 = vweird.f32 %v2295_v59  ;;  %v933_v50 = vand.u32 2147483648, %v2295_v59  ;;  %v931_v14 = vand.u32 2147483647, %v2295_v59  ;;  %v946_v44 = vsel %vm255_vm0, %v945_v7, %v944_v54 }
 0x6e3   :  { %v1704_v49 = vpop.eup %1703  ;;  %v904_v24 = vor.u32 1.1754944e-38, %v903_v5  ;;  %v919_v25 = vor.u32 1.1754944e-38, %v918_v17  ;;  %vm917_vm12 = vcmp.eq.f32.partialorder %v916_v13, 8.507059e+37 }
 0x6e4   :  { %v1706_v57 = vpop.eup %1705  ;;  %v878_v6 = vmul.f32 %v1704_v49, %v873_v51  ;;  %vm883_vm6 = vweird.f32 %v1704_v49  ;;  %v934_v34 = vor.u32 1.1754944e-38, %v933_v50 }
 0x6e5   :  { %v1708_v52 = vpop.eup %1707  ;;  %v908_v46 = vmul.f32 %v1706_v57, %v875_v40  ;;  %vm913_vm7 = vweird.f32 %v1706_v57  ;;  %vm884_vm8 = vmor %vm882_vm14, %vm883_vm6 }
 0x6e6   :  { %v1710_v1 = vpop.eup %1709  ;;  %v879_v2 = vsub.f32 1.0, %v878_v6  ;;  %v893_v3 = vmul.f32 %v1708_v52, %v874_v58  ;;  %vm898_vm3 = vweird.f32 %v1708_v52  ;;  %vm914_vm13 = vmor %vm912_vm4, %vm913_vm7  ;;  %vm932_vm4 = vcmp.eq.f32.partialorder %v931_v14, 8.507059e+37 }
 0x6e7   :  { %v909_v8 = vsub.f32 1.0, %v908_v46  ;;  %v923_v9 = vmul.f32 %v1710_v1, %v2295_v59  ;;  %vm928_vm9 = vweird.f32 %v1710_v1  ;;  %vm899_vm11 = vmor %vm897_vm2, %vm898_vm3 }
 0x6e8   :  { %v894_v15 = vsub.f32 1.0, %v893_v3  ;;  %v880_v16 = vmul.f32 %v1704_v49, %v879_v2  ;;  %vm929_vm14 = vmor %vm927_vm10, %vm928_vm9 }
 0x6e9   :  { %v924_v18 = vsub.f32 1.0, %v923_v9  ;;  %v910_v19 = vmul.f32 %v1706_v57, %v909_v8 }
 0x6ea   :  { %v881_v20 = vadd.f32 %v1704_v49, %v880_v16  ;;  %v895_v11 = vmul.f32 %v1708_v52, %v894_v15 }
 0x6eb   :  { %v911_v21 = vadd.f32 %v1706_v57, %v910_v19  ;;  %v925_v10 = vmul.f32 %v1710_v1, %v924_v18 }
 0x6ec   :  { %v885_v23 = vsel %vm884_vm8, %v1704_v49, %v881_v20  ;;  %v896_v62 = vadd.f32 %v1708_v52, %v895_v11 }
 0x6ed   :  { %v890_v26 = vsel %vm2304_vm15, %v889_v4, %v885_v23  ;;  %v915_v27 = vsel %vm914_vm13, %v1706_v57, %v911_v21  ;;  %v926_v28 = vadd.f32 %v1710_v1, %v925_v10  ;;  %vm2539_vm15 = vcmask 523264  }
 0x6ee   :  { %v900_v29 = vsel %vm899_vm11, %v1708_v52, %v896_v62  ;;  %v920_v61 = vsel %vm917_vm12, %v919_v25, %v915_v27  ;;  %v953_v35 = vrot.slane %v890_v26, 4  ;;  %vm2540_vm2 = vmmov %vm2539_vm15 }
 0x6ef   :  { %v905_v36 = vsel %vm2309_vm5, %v904_v24, %v900_v29  ;;  %v930_v37 = vsel %vm929_vm14, %v1710_v1, %v926_v28  ;;  %v954_v39 = vrot.slane %v920_v61, 3 }
 0x6f0   :  { %v935_v41 = vsel %vm932_vm4, %v934_v34, %v930_v37  ;;  %v956_v45 = vrot.slane %v905_v36, 4 }
 0x6f1   :  { %v957_v38 = vrot.slane %v935_v41, 3  ;;  %v955_v48 = vsel %vm255_vm0, %v954_v39, %v953_v35 }
 0x6f2   :  { %v963_v56 = vmul.f32 %v955_v48, %v2285_v22 }
 0x6f3   :  { %v958_v51 = vsel %vm255_vm0, %v957_v38, %v956_v45 }
 0x6f4   :  { %v962_v55 = vsel %vm111_vm1, %v946_v44, %v958_v51 }
 0x6f5   :  { %v964_v40 = vmul.f32 %v962_v55, %v955_v48 }
 0x6f7   :  { %966 = vrot.lane.b32.xlu2 %v964_v40, %s1806_s3 }
 0x751   :  { %v967_v58 = vpop.permute.xlu2 %966 }
 0x752   :  { %v2332_v59 = vadd.f32 %v967_v58, %v963_v56 }
 0x754   :  { %1711 = vtanh.f32 %v2332_v59 }
 0x75a   :  { %v1712_v53 = vpop.eup %1711 }
 0x75b   :  { %v971_v42 = vmul.f32 %v1712_v53, %v962_v55 }
 0x75d   :  { %973 = vrot.lane.b32.xlu0 %v971_v42, %s1806_s3 }
 0x7cf   :  { %v974_v47 = vpop.permute.xlu0 %973 }
 0x7d0   :  { %1580 = vmatmul.msk.f32.vlgmr.msrb.gmra.mxu0 %vm2539_vm15, %v974_v47  ;;  %1581 = vmatmul.msk.f32.vlgmr.msrb.gmra.mxu1 %vm2540_vm2, %v974_v47 }
 0x84d   :  { %v994_v63 = vpop.f32.mrf.mxu0  ;;  %v1014_v49 = vpop.f32.mrf.mxu1 }
 0x84e   :  { %v1019_v43 = vrot.slane %v994_v63, 3  ;;  %v1021_v57 = vrot.slane %v994_v63, 4  ;;  %v1020_v6 = vrot.slane %v1014_v49, 3  ;;  %v1022_v22 = vrot.slane %v1014_v49, 4 }
 0x850   :  { %v1027_v54 = vadd.f32 %v1019_v43, %v2028_v30  ;;  %v1029_v7 = vadd.f32 %v1021_v57, %v2032_v32  ;;  %v1028_v52 = vadd.f32 %v1020_v6, %v2030_v31  ;;  %v1030_v46 = vadd.f32 %v1022_v22, %v2034_v33 }
 0x852   :  { %v1582_v0 = vmul.f32 -1.442695, %v1027_v54  ;;  %v1584_v1 = vmul.f32 -1.442695, %v1029_v7  ;;  %v1583_v2 = vmul.f32 -1.442695, %v1028_v52 }
 0x853   :  { %v1585_v3 = vmul.f32 -1.442695, %v1030_v46 }
 0x854   :  { %1713 = vpow2.f32 %v1582_v0 }
 0x855   :  { %1715 = vpow2.f32 %v1584_v1 }
 0x856   :  { %1717 = vpow2.f32 %v1583_v2 }
 0x857   :  { %1719 = vpow2.f32 %v1585_v3 }
 0x858   :  { %1721 = vtanh.f32 %v1028_v52 }
 0x859   :  { %1723 = vtanh.f32 %v1030_v46 }
 0x85a   :  { %v1714_v4 = vpop.eup %1713 }
 0x85b   :  { %v1716_v5 = vpop.eup %1715  ;;  %v1047_v8 = vadd.f32 1.0, %v1714_v4 }
 0x85c   :  { %v1718_v9 = vpop.eup %1717  ;;  %v1049_v12 = vadd.f32 1.0, %v1716_v5 }
 0x85d   :  { %v1720_v13 = vpop.eup %1719  ;;  %1725 = vrcp.f32 %v1047_v8  ;;  %v1048_v15 = vadd.f32 1.0, %v1718_v9  ;;  %v1060_v19 = vand.u32 2147483647, %v1047_v8  ;;  %v1062_v20 = vand.u32 2147483648, %v1047_v8 }
 0x85e   :  { %1727 = vrcp.f32 %v1049_v12  ;;  %v2342_v16 = vadd.f32 1.0, %v1720_v13  ;;  %v2344_v17 = vpop.eup %1721  ;;  %vm1056_vm5 = vweird.f32 %v1047_v8  ;;  %vm1086_vm10 = vweird.f32 %v1049_v12 }
 0x85f   :  { %1729 = vrcp.f32 %v1048_v15  ;;  %v2347_v18 = vpop.eup %1723  ;;  %v1075_v50 = vand.u32 2147483647, %v1048_v15  ;;  %v1118_v14 = vrot.slane %v2344_v17, 5  ;;  %vm2351_vm6 = vcmp.eq.f32.partialorder %v1060_v19, 8.507059e+37 }
 0x860   :  { %1731 = vrcp.f32 %v2342_v16  ;;  %v1119_v23 = vrot.slane %v2347_v18, 4  ;;  %vm1071_vm7 = vweird.f32 %v1048_v15  ;;  %v1063_v29 = vor.u32 1.1754944e-38, %v1062_v20 }
 0x861   :  { %v1077_v61 = vand.u32 2147483648, %v1048_v15  ;;  %vm2356_vm3 = vcmp.eq.f32.partialorder %v1075_v50, 8.507059e+37  ;;  %v1090_v37 = vand.u32 2147483647, %v1049_v12  ;;  %v1092_v45 = vand.u32 2147483648, %v1049_v12 }
 0x862   :  { %vm1101_vm13 = vweird.f32 %v2342_v16  ;;  %v1107_v55 = vand.u32 2147483648, %v2342_v16  ;;  %v1105_v58 = vand.u32 2147483647, %v2342_v16  ;;  %v1120_v5 = vsel %vm255_vm0, %v1119_v23, %v1118_v14 }
 0x863   :  { %v1726_v11 = vpop.eup %1725  ;;  %v1078_v47 = vor.u32 1.1754944e-38, %v1077_v61  ;;  %v1093_v63 = vor.u32 1.1754944e-38, %v1092_v45  ;;  %vm1091_vm2 = vcmp.eq.f32.partialorder %v1090_v37, 8.507059e+37 }
 0x864   :  { %v1728_v21 = vpop.eup %1727  ;;  %v1052_v10 = vmul.f32 %v1726_v11, %v1047_v8  ;;  %vm1057_vm8 = vweird.f32 %v1726_v11  ;;  %v1108_v54 = vor.u32 1.1754944e-38, %v1107_v55 }
 0x865   :  { %v1730_v62 = vpop.eup %1729  ;;  %v1082_v24 = vmul.f32 %v1728_v21, %v1049_v12  ;;  %vm1087_vm9 = vweird.f32 %v1728_v21  ;;  %vm1058_vm12 = vmor %vm1056_vm5, %vm1057_vm8 }
 0x866   :  { %v1732_v26 = vpop.eup %1731  ;;  %v1053_v27 = vsub.f32 1.0, %v1052_v10  ;;  %v1067_v28 = vmul.f32 %v1730_v62, %v1048_v15  ;;  %vm1072_vm11 = vweird.f32 %v1730_v62  ;;  %vm1088_vm4 = vmor %vm1086_vm10, %vm1087_vm9  ;;  %vm1106_vm10 = vcmp.eq.f32.partialorder %v1105_v58, 8.507059e+37 }
 0x867   :  { %v1083_v34 = vsub.f32 1.0, %v1082_v24  ;;  %v1097_v35 = vmul.f32 %v1732_v26, %v2342_v16  ;;  %vm1102_vm14 = vweird.f32 %v1732_v26  ;;  %vm1073_vm15 = vmor %vm1071_vm7, %vm1072_vm11 }
 0x868   :  { %v1068_v39 = vsub.f32 1.0, %v1067_v28  ;;  %v1054_v41 = vmul.f32 %v1726_v11, %v1053_v27  ;;  %vm1103_vm5 = vmor %vm1101_vm13, %vm1102_vm14 }
 0x869   :  { %v1098_v38 = vsub.f32 1.0, %v1097_v35  ;;  %v1084_v48 = vmul.f32 %v1728_v21, %v1083_v34 }
 0x86a   :  { %v1055_v44 = vadd.f32 %v1726_v11, %v1054_v41  ;;  %v1069_v51 = vmul.f32 %v1730_v62, %v1068_v39 }
 0x86b   :  { %v1085_v40 = vadd.f32 %v1728_v21, %v1084_v48  ;;  %v1099_v56 = vmul.f32 %v1732_v26, %v1098_v38 }
 0x86c   :  { %v1059_v53 = vsel %vm1058_vm12, %v1726_v11, %v1055_v44  ;;  %v1070_v42 = vadd.f32 %v1730_v62, %v1069_v51 }
 0x86d   :  { %v1064_v49 = vsel %vm2351_vm6, %v1063_v29, %v1059_v53  ;;  %v1089_v43 = vsel %vm1088_vm4, %v1728_v21, %v1085_v40  ;;  %v1100_v57 = vadd.f32 %v1732_v26, %v1099_v56  ;;  %vm2545_vm6 = vcmask 523264  }
 0x86e   :  { %v1074_v6 = vsel %vm1073_vm15, %v1730_v62, %v1070_v42  ;;  %v1094_v22 = vsel %vm1091_vm2, %v1093_v63, %v1089_v43  ;;  %v1127_v7 = vrot.slane %v1064_v49, 5  ;;  %vm2546_vm7 = vmmov %vm2545_vm6 }
 0x86f   :  { %v1079_v52 = vsel %vm2356_vm3, %v1078_v47, %v1074_v6  ;;  %v1104_v46 = vsel %vm1103_vm5, %v1732_v26, %v1100_v57  ;;  %v1128_v0 = vrot.slane %v1094_v22, 4 }
 0x870   :  { %v1109_v1 = vsel %vm1106_vm10, %v1108_v54, %v1104_v46  ;;  %v1130_v2 = vrot.slane %v1079_v52, 5 }
 0x871   :  { %v1131_v3 = vrot.slane %v1109_v1, 4  ;;  %v1129_v4 = vsel %vm255_vm0, %v1128_v0, %v1127_v7 }
 0x872   :  { %v1137_v13 = vmul.f32 %v1129_v4, %v2332_v59 }
 0x873   :  { %v1132_v8 = vsel %vm255_vm0, %v1131_v3, %v1130_v2 }
 0x874   :  { %v1136_v9 = vsel %vm111_vm1, %v1120_v5, %v1132_v8 }
 0x875   :  { %v1138_v12 = vmul.f32 %v1136_v9, %v1129_v4 }
 0x877   :  { %1140 = vrot.lane.b32.xlu1 %v1138_v12, %s1806_s3 }
 0x8e9   :  { %v1141_v15 = vpop.permute.xlu1 %1140 }
 0x8ea   :  { %v2379_v16 = vadd.f32 %v1141_v15, %v1137_v13 }
 0x8ec   :  { %1733 = vtanh.f32 %v2379_v16 }
 0x8f2   :  { %v1734_v17 = vpop.eup %1733 }
 0x8f3   :  { %v1145_v18 = vmul.f32 %v1734_v17, %v1136_v9 }
 0x8f5   :  { %1147 = vrot.lane.b32.xlu2 %v1145_v18, %s1806_s3 }
 0x94f   :  { %v1148_v19 = vpop.permute.xlu2 %1147 }
 0x950   :  { %1586 = vmatmul.msk.f32.vlgmr.msrb.gmra.mxu2 %vm2545_vm6, %v1148_v19  ;;  %1587 = vmatmul.msk.f32.vlgmr.msrb.gmra.mxu3 %vm2546_vm7, %v1148_v19 }
 0x9d3   :  { %v1168_v20 = vpop.f32.mrf.mxu2  ;;  %v1188_v11 = vpop.f32.mrf.mxu3 }
 0x9d4   :  { %v1193_v50 = vrot.slane %v1168_v20, 2  ;;  %v1195_v21 = vrot.slane %v1168_v20, 3  ;;  %v1194_v10 = vrot.slane %v1188_v11, 2  ;;  %v1196_v59 = vrot.slane %v1188_v11, 3 }
 0x9d6   :  { %v1201_v14 = vadd.f32 %v1193_v50, %v2028_v30  ;;  %v1203_v23 = vadd.f32 %v1195_v21, %v2032_v32  ;;  %v1202_v62 = vadd.f32 %v1194_v10, %v2030_v31  ;;  %v1204_v24 = vadd.f32 %v1196_v59, %v2034_v33 }
 0x9d8   :  { %v1588_v25 = vmul.f32 -1.442695, %v1201_v14  ;;  %v1590_v26 = vmul.f32 -1.442695, %v1203_v23  ;;  %v1589_v27 = vmul.f32 -1.442695, %v1202_v62 }
 0x9d9   :  { %v1591_v28 = vmul.f32 -1.442695, %v1204_v24 }
 0x9da   :  { %1735 = vpow2.f32 %v1588_v25 }
 0x9db   :  { %1737 = vpow2.f32 %v1590_v26 }
 0x9dc   :  { %1739 = vpow2.f32 %v1589_v27 }
 0x9dd   :  { %1741 = vpow2.f32 %v1591_v28 }
 0x9de   :  { %1743 = vtanh.f32 %v1202_v62 }
 0x9df   :  { %1745 = vtanh.f32 %v1204_v24 }
 0x9e0   :  { %v1736_v29 = vpop.eup %1735 }
 0x9e1   :  { %v1738_v61 = vpop.eup %1737  ;;  %v1221_v34 = vadd.f32 1.0, %v1736_v29 }
 0x9e2   :  { %v1740_v35 = vpop.eup %1739  ;;  %v1223_v36 = vadd.f32 1.0, %v1738_v61 }
 0x9e3   :  { %v1742_v37 = vpop.eup %1741  ;;  %1747 = vrcp.f32 %v1221_v34  ;;  %v1222_v39 = vadd.f32 1.0, %v1740_v35  ;;  %v1234_v48 = vand.u32 2147483647, %v1221_v34  ;;  %v1236_v44 = vand.u32 2147483648, %v1221_v34 }
 0x9e4   :  { %1749 = vrcp.f32 %v1223_v36  ;;  %v2389_v41 = vadd.f32 1.0, %v1742_v37  ;;  %v2391_v45 = vpop.eup %1743  ;;  %vm1230_vm3 = vweird.f32 %v1221_v34  ;;  %vm1260_vm13 = vweird.f32 %v1223_v36 }
 0x9e5   :  { %1751 = vrcp.f32 %v1222_v39  ;;  %v2394_v38 = vpop.eup %1745  ;;  %v1249_v55 = vand.u32 2147483647, %v1222_v39  ;;  %v1292_v58 = vrot.slane %v2391_v45, 6  ;;  %vm2398_vm8 = vcmp.eq.f32.partialorder %v1234_v48, 8.507059e+37 }
 0x9e6   :  { %1753 = vrcp.f32 %v2389_v41  ;;  %v1293_v53 = vrot.slane %v2394_v38, 5  ;;  %vm1245_vm9 = vweird.f32 %v1222_v39  ;;  %v1237_v6 = vor.u32 1.1754944e-38, %v1236_v44 }
 0x9e7   :  { %v1251_v22 = vand.u32 2147483648, %v1222_v39  ;;  %vm2403_vm11 = vcmp.eq.f32.partialorder %v1249_v55, 8.507059e+37  ;;  %v1264_v46 = vand.u32 2147483647, %v1223_v36  ;;  %v1266_v2 = vand.u32 2147483648, %v1223_v36 }
 0x9e8   :  { %vm1275_vm4 = vweird.f32 %v2389_v41  ;;  %v1281_v9 = vand.u32 2147483648, %v2389_v41  ;;  %v1279_v15 = vand.u32 2147483647, %v2389_v41  ;;  %v1294_v61 = vsel %vm255_vm0, %v1293_v53, %v1292_v58 }
 0x9e9   :  { %v1748_v51 = vpop.eup %1747  ;;  %v1252_v19 = vor.u32 1.1754944e-38, %v1251_v22  ;;  %v1267_v20 = vor.u32 1.1754944e-38, %v1266_v2  ;;  %vm1265_vm7 = vcmp.eq.f32.partialorder %v1264_v46, 8.507059e+37 }
 0x9ea   :  { %v1750_v40 = vpop.eup %1749  ;;  %v1226_v56 = vmul.f32 %v1748_v51, %v1221_v34  ;;  %vm1231_vm12 = vweird.f32 %v1748_v51  ;;  %v1282_v14 = vor.u32 1.1754944e-38, %v1281_v9 }
 0x9eb   :  { %v1752_v42 = vpop.eup %1751  ;;  %v1256_v47 = vmul.f32 %v1750_v40, %v1223_v36  ;;  %vm1261_vm14 = vweird.f32 %v1750_v40  ;;  %vm1232_vm2 = vmor %vm1230_vm3, %vm1231_vm12 }
 0x9ec   :  { %v1754_v49 = vpop.eup %1753  ;;  %v1227_v43 = vsub.f32 1.0, %v1226_v56  ;;  %v1241_v57 = vmul.f32 %v1752_v42, %v1222_v39  ;;  %vm1246_vm15 = vweird.f32 %v1752_v42  ;;  %vm1262_vm10 = vmor %vm1260_vm13, %vm1261_vm14  ;;  %vm1280_vm13 = vcmp.eq.f32.partialorder %v1279_v15, 8.507059e+37 }
 0x9ed   :  { %v1257_v54 = vsub.f32 1.0, %v1256_v47  ;;  %v1271_v7 = vmul.f32 %v1754_v49, %v2389_v41  ;;  %vm1276_vm5 = vweird.f32 %v1754_v49  ;;  %vm1247_vm6 = vmor %vm1245_vm9, %vm1246_vm15 }
 0x9ee   :  { %v1242_v0 = vsub.f32 1.0, %v1241_v57  ;;  %v1228_v1 = vmul.f32 %v1748_v51, %v1227_v43  ;;  %vm1277_vm3 = vmor %vm1275_vm4, %vm1276_vm5 }
 0x9ef   :  { %v1272_v3 = vsub.f32 1.0, %v1271_v7  ;;  %v1258_v4 = vmul.f32 %v1750_v40, %v1257_v54 }
 0x9f0   :  { %v1229_v5 = vadd.f32 %v1748_v51, %v1228_v1  ;;  %v1243_v8 = vmul.f32 %v1752_v42, %v1242_v0 }
 0x9f1   :  { %v1259_v12 = vadd.f32 %v1750_v40, %v1258_v4  ;;  %v1273_v13 = vmul.f32 %v1754_v49, %v1272_v3 }
 0x9f2   :  { %v1233_v17 = vsel %vm1232_vm2, %v1748_v51, %v1229_v5  ;;  %v1244_v18 = vadd.f32 %v1752_v42, %v1243_v8 }
 0x9f3   :  { %v1238_v11 = vsel %vm2398_vm8, %v1237_v6, %v1233_v17  ;;  %v1263_v50 = vsel %vm1262_vm10, %v1750_v40, %v1259_v12  ;;  %v1274_v21 = vadd.f32 %v1754_v49, %v1273_v13  ;;  %vm2551_vm8 = vcmask 523264  }
 0x9f4   :  { %v1248_v10 = vsel %vm1247_vm6, %v1752_v42, %v1244_v18  ;;  %v1268_v59 = vsel %vm1265_vm7, %v1267_v20, %v1263_v50  ;;  %v1301_v23 = vrot.slane %v1238_v11, 6  ;;  %vm2552_vm9 = vmmov %vm2551_vm8 }
 0x9f5   :  { %v1253_v62 = vsel %vm2403_vm11, %v1252_v19, %v1248_v10  ;;  %v1278_v24 = vsel %vm1277_vm3, %v1754_v49, %v1274_v21  ;;  %v1302_v25 = vrot.slane %v1268_v59, 5 }
 0x9f6   :  { %v1283_v26 = vsel %vm1280_vm13, %v1282_v14, %v1278_v24  ;;  %v1304_v27 = vrot.slane %v1253_v62, 6 }
 0x9f7   :  { %v1305_v28 = vrot.slane %v1283_v26, 5  ;;  %v1303_v29 = vsel %vm255_vm0, %v1302_v25, %v1301_v23 }
 0x9f8   :  { %v1311_v37 = vmul.f32 %v1303_v29, %v2379_v16 }
 0x9f9   :  { %v1306_v34 = vsel %vm255_vm0, %v1305_v28, %v1304_v27 }
 0x9fa   :  { %v1310_v35 = vsel %vm111_vm1, %v1294_v61, %v1306_v34 }
 0x9fb   :  { %v1312_v36 = vmul.f32 %v1310_v35, %v1303_v29 }
 0x9fd   :  { %1314 = vrot.lane.b32.xlu0 %v1312_v36, %s1806_s3 }
 0xa6f   :  { %v1315_v39 = vpop.permute.xlu0 %1314 }
 0xa70   :  { %v2426_v41 = vadd.f32 %v1315_v39, %v1311_v37 }
 0xa72   :  { %1755 = vtanh.f32 %v2426_v41 }
 0xa78   :  { %v1756_v45 = vpop.eup %1755 }
 0xa79   :  { %v1319_v38 = vmul.f32 %v1756_v45, %v1310_v35 }
 0xa7b   :  { %1321 = vrot.lane.b32.xlu1 %v1319_v38, %s1806_s3 }
 0xaed   :  { %v1322_v48 = vpop.permute.xlu1 %1321 }
 0xaee   :  { %1592 = vmatmul.msk.f32.vlgmr.msra.gmra.mxu0 %vm2551_vm8, %v1322_v48  ;;  %1593 = vmatmul.msk.f32.vlgmr.msra.gmra.mxu1 %vm2552_vm9, %v1322_v48 }
 0xb6b   :  { %v1342_v44 = vpop.f32.mrf.mxu0  ;;  %v1362_v51 = vpop.f32.mrf.mxu1 }
 0xb6c   :  { %v1367_v55 = vrot.slane %v1342_v44, 1  ;;  %v1369_v40 = vrot.slane %v1342_v44, 2  ;;  %v1368_v56 = vrot.slane %v1362_v51, 1  ;;  %v1370_v16 = vrot.slane %v1362_v51, 2 }
 0xb6e   :  { %v1375_v58 = vadd.f32 %v1367_v55, %v2028_v30  ;;  %v1377_v53 = vadd.f32 %v1369_v40, %v2032_v32  ;;  %v1376_v42 = vadd.f32 %v1368_v56, %v2030_v31  ;;  %v1378_v47 = vadd.f32 %v1370_v16, %v2034_v33 }
 0xb70   :  { %v1594_v63 = vmul.f32 -1.442695, %v1375_v58  ;;  %v1596_v49 = vmul.f32 -1.442695, %v1377_v53  ;;  %v1595_v43 = vmul.f32 -1.442695, %v1376_v42 }
 0xb71   :  { %v1597_v57 = vmul.f32 -1.442695, %v1378_v47 }
 0xb72   :  { %1757 = vpow2.f32 %v1594_v63 }
 0xb73   :  { %1759 = vpow2.f32 %v1596_v49 }
 0xb74   :  { %1761 = vpow2.f32 %v1595_v43 }
 0xb75   :  { %1763 = vpow2.f32 %v1597_v57 }
 0xb76   :  { %1765 = vtanh.f32 %v1376_v42 }
 0xb77   :  { %1767 = vtanh.f32 %v1378_v47 }
 0xb78   :  { %v1758_v6 = vpop.eup %1757 }
 0xb79   :  { %v1760_v22 = vpop.eup %1759  ;;  %v1395_v54 = vadd.f32 1.0, %v1758_v6 }
 0xb7a   :  { %v1762_v30 = vpop.eup %1761  ;;  %v1397_v7 = vadd.f32 1.0, %v1760_v22  ;;  %v1501_v22 = vld [vmem:[%s2509_s4 + $0x38] sm:$0xff] }
 0xb7b   :  { %v1764_v32 = vpop.eup %1763  ;;  %1769 = vrcp.f32 %v1395_v54  ;;  %v1396_v31 = vadd.f32 1.0, %v1762_v30  ;;  %v1408_v0 = vand.u32 2147483647, %v1395_v54  ;;  %v1410_v1 = vand.u32 2147483648, %v1395_v54  ;;  %1519 = vmatpush.msra.mxu2 %v1501_v22  ;;  %v1499_v30 = vld [vmem:[%s2509_s4 + $0x28] sm:$0xff] }
 0xb7c   :  { %1771 = vrcp.f32 %v1397_v7  ;;  %v2436_v33 = vadd.f32 1.0, %v1764_v32  ;;  %v2438_v52 = vpop.eup %1765  ;;  %vm1404_vm11 = vweird.f32 %v1395_v54  ;;  %vm1434_vm4 = vweird.f32 %v1397_v7  ;;  %v1496_v32 = vld [vmem:[%s2509_s4 + $0x10] sm:$0xff] }
 0xb7d   :  { %1773 = vrcp.f32 %v1396_v31  ;;  %v2441_v46 = vpop.eup %1767  ;;  %v1423_v3 = vand.u32 2147483647, %v1396_v31  ;;  %v1466_v8 = vrot.slane %v2438_v52, 7  ;;  %vm2445_vm12 = vcmp.eq.f32.partialorder %v1408_v0, 8.507059e+37 }
 0xb7e   :  { %1775 = vrcp.f32 %v2436_v33  ;;  %v1467_v9 = vrot.slane %v2441_v46, 6  ;;  %vm1419_vm14 = vweird.f32 %v1396_v31  ;;  %v1411_v20 = vor.u32 1.1754944e-38, %v1410_v1 }
 0xb7f   :  { %v1425_v11 = vand.u32 2147483648, %v1396_v31  ;;  %vm2450_vm15 = vcmp.eq.f32.partialorder %v1423_v3, 8.507059e+37  ;;  %v1438_v59 = vand.u32 2147483647, %v1397_v7  ;;  %v1440_v62 = vand.u32 2147483648, %v1397_v7 }
 0xb80   :  { %vm1449_vm10 = vweird.f32 %v2436_v33  ;;  %v1455_v28 = vand.u32 2147483648, %v2436_v33  ;;  %v1453_v34 = vand.u32 2147483647, %v2436_v33  ;;  %v1468_v49 = vsel %vm255_vm0, %v1467_v9, %v1466_v8 }
 0xb81   :  { %v1770_v2 = vpop.eup %1769  ;;  %v1426_v37 = vor.u32 1.1754944e-38, %v1425_v11  ;;  %v1441_v39 = vor.u32 1.1754944e-38, %v1440_v62  ;;  %vm1439_vm9 = vcmp.eq.f32.partialorder %v1438_v59, 8.507059e+37 }
 0xb82   :  { %v1772_v4 = vpop.eup %1771  ;;  %v1400_v5 = vmul.f32 %v1770_v2, %v1395_v54  ;;  %vm1405_vm2 = vweird.f32 %v1770_v2  ;;  %v1456_v55 = vor.u32 1.1754944e-38, %v1455_v28  ;;  %v1500_v54 = vld [vmem:[%s2509_s4 + $0x30] sm:$0xff] }
 0xb83   :  { %v1774_v12 = vpop.eup %1773  ;;  %v1430_v13 = vmul.f32 %v1772_v4, %v1397_v7  ;;  %vm1435_vm5 = vweird.f32 %v1772_v4  ;;  %vm1406_vm7 = vmor %vm1404_vm11, %vm1405_vm2  ;;  %1520 = vmatpush.msra.mxu2 %v1500_v54  ;;  %v1497_v7 = vld [vmem:[%s2509_s4 + $0x18] sm:$0xff] }
 0xb84   :  { %v1776_v17 = vpop.eup %1775  ;;  %v1401_v18 = vsub.f32 1.0, %v1400_v5  ;;  %v1415_v19 = vmul.f32 %v1774_v12, %v1396_v31  ;;  %vm1420_vm6 = vweird.f32 %v1774_v12  ;;  %vm1436_vm13 = vmor %vm1434_vm4, %vm1435_vm5  ;;  %vm1454_vm4 = vcmp.eq.f32.partialorder %v1453_v34, 8.507059e+37  ;;  %v1495_v31 = vld [vmem:[%s2509_s4 + $0x8] sm:$0xff] }
 0xb85   :  { %v1431_v50 = vsub.f32 1.0, %v1430_v13  ;;  %v1445_v21 = vmul.f32 %v1776_v17, %v2436_v33  ;;  %vm1450_vm3 = vweird.f32 %v1776_v17  ;;  %vm1421_vm8 = vmor %vm1419_vm14, %vm1420_vm6  ;;  %1521 = vmatpush.msra.mxu2 %v1499_v30  ;;  %v1494_v33 = vld [vmem:[%s2509_s4] sm:$0xff]  ;;  %s1537_s4 = sshll.u32 %s1807_s9, 4  ;;  %s1538_s4 = int_to_ptr.vmem [resolvable:$true] %s1537_s4 }
 0xb86   :  { %v1416_v14 = vsub.f32 1.0, %v1415_v19  ;;  %v1402_v23 = vmul.f32 %v1770_v2, %v1401_v18  ;;  %vm1451_vm11 = vmor %vm1449_vm10, %vm1450_vm3 }
 0xb87   :  { %v1446_v24 = vsub.f32 1.0, %v1445_v21  ;;  %v1432_v25 = vmul.f32 %v1772_v4, %v1431_v50  ;;  %1522 = vmatpush.msra.mxu2 %v1498_v60 }
 0xb88   :  { %v1403_v26 = vadd.f32 %v1770_v2, %v1402_v23  ;;  %v1417_v27 = vmul.f32 %v1774_v12, %v1416_v14 }
 0xb89   :  { %v1433_v29 = vadd.f32 %v1772_v4, %v1432_v25  ;;  %v1447_v61 = vmul.f32 %v1776_v17, %v1446_v24  ;;  %1523 = vmatpush.msra.mxu2 %v1497_v7 }
 0xb8a   :  { %v1407_v35 = vsel %vm1406_vm7, %v1770_v2, %v1403_v26  ;;  %v1418_v36 = vadd.f32 %v1774_v12, %v1417_v27 }
 0xb8b   :  { %v1412_v45 = vsel %vm2445_vm12, %v1411_v20, %v1407_v35  ;;  %v1437_v38 = vsel %vm1436_vm13, %v1772_v4, %v1433_v29  ;;  %v1448_v48 = vadd.f32 %v1776_v17, %v1447_v61  ;;  %1524 = vmatpush.msra.mxu2 %v1496_v32  ;;  %v1602_v4 = vld [vmem:[%s2510_s5] ss:$0 sm:$0xff] }
 0xb8c   :  { %v1422_v44 = vsel %vm1421_vm8, %v1774_v12, %v1418_v36  ;;  %v1442_v51 = vsel %vm1439_vm9, %v1441_v39, %v1437_v38  ;;  %v1475_v40 = vrot.slane %v1412_v45, 7 }
 0xb8d   :  { %v1427_v56 = vsel %vm2450_vm15, %v1426_v37, %v1422_v44  ;;  %v1452_v16 = vsel %vm1451_vm11, %v1776_v17, %v1448_v48  ;;  %v1476_v58 = vrot.slane %v1442_v51, 6  ;;  %1525 = vmatpush.msra.mxu2 %v1495_v31 }
 0xb8e   :  { %v1457_v53 = vsel %vm1454_vm4, %v1456_v55, %v1452_v16  ;;  %v1478_v42 = vrot.slane %v1427_v56, 7 }
 0xb8f   :  { %v1479_v47 = vrot.slane %v1457_v53, 6  ;;  %v1477_v63 = vsel %vm255_vm0, %v1476_v58, %v1475_v40  ;;  %1526 = vmatpush.msra.mxu2 %v1494_v33 }
 0xb90   :  { %v1485_v52 = vmul.f32 %v1477_v63, %v2426_v41 }
 0xb91   :  { %v1480_v43 = vsel %vm255_vm0, %v1479_v47, %v1478_v42  ;;  %vm2557_vm0 = vcmask 523264  }
 0xb92   :  { %v1484_v57 = vsel %vm111_vm1, %v1468_v49, %v1480_v43 }
 0xb93   :  { %v1486_v6 = vmul.f32 %v1484_v57, %v1477_v63 }
 0xb95   :  { %1488 = vrot.lane.b32.xlu2 %v1486_v6, %s1806_s3 }
 0xbef   :  { %v1489_v46 = vpop.permute.xlu2 %1488 }
 0xbf0   :  { %v1491_v0 = vadd.f32 %v1489_v46, %v1485_v52 }
 0xbf2   :  { %1777 = vtanh.f32 %v1491_v0 }
 0xbf8   :  { %v1778_v1 = vpop.eup %1777 }
 0xbf9   :  { %v1493_v2 = vmul.f32 %v1778_v1, %v1484_v57 }
 0xbfb   :  { %1507 = vrot.lane.b32.xlu0 %v1493_v2, %s1806_s3 }
 0xc6d   :  { %v1508_v3 = vpop.permute.xlu0 %1507 }
 0xc6e   :  { %1598 = vmatmul.msk.f32.vlgmr.msra.gmra.mxu2 %vm2557_vm0, %v1508_v3 }
 0xcf1   :  { %v1528_v41 = vpop.f32.mrf.mxu2 }
 0xcf2   :  { %v1529_v5 = vadd.f32 %v1602_v4, %v1528_v41 }
 0xcf4   :  { %1531 = vst [vmem:[#allocation2] sm:$0x3] %v1529_v5 }
 0xcf5   :  { %1542 = dma.vmem_to_hbm [thread:$0]  %s1538_s4, 32, %s1540_s12, [#allocation3]  }
 0xcf6   :  { %1803 = dma.done.wait [#allocation3], 32  }
 0xcf7   :  { %1804 = vsyncadd [#allocation3], 4294967264 }
 0xcf8   :  { %1547 = vsyncpa [#allocation3], 1 }

</bundles_post_ra>
